<compile_context>
chip_gen: v6e
topology: v6e:2x2x1
jax: 0.10.0
libtpu: 0.0.40
codegen_flags: <defaults>
</compile_context>

<pallas_src>
import functools

import jax
import jax.numpy as jnp
from jax import lax
from jax.experimental import pallas as pl
from jax.experimental.pallas import tpu as pltpu

NUM_GROUPS = 32
EPS = 1e-5


def _mha_fm_kernel(x_ref, gamma_ref, beta_ref, avg_ref, wqkv_ref, wo_ref, o_ref,
                   *, num_heads):
    # x block: (1, C, S) f32 -- channels on sublanes, flattened spatial on lanes.
    x = x_ref[0]                                   # (C, S) f32
    C, S = x.shape
    hd = C // num_heads

    # ---------------- GroupNorm(32, C) ----------------
    # Per-channel sums (lane reduce) folded into per-group means with a
    # precomputed (C, C) group-averaging matrix (MXU).  Stats stay f32.
    sum_x = jnp.sum(x, axis=1, keepdims=True)          # (C, 1)
    sum_x2 = jnp.sum(x * x, axis=1, keepdims=True)     # (C, 1)
    mean_c = jnp.dot(avg_ref[...], sum_x, preferred_element_type=jnp.float32)   # (C, 1)
    ex2_c = jnp.dot(avg_ref[...], sum_x2, preferred_element_type=jnp.float32)   # (C, 1)
    # NOTE: E[x^2] - E[x]^2 (fine for O(1) activations; matches biased torch var).
    var_c = ex2_c - mean_c * mean_c
    inv_std = lax.rsqrt(var_c + EPS)
    xn = (x - mean_c) * (inv_std * gamma_ref[...]) + beta_ref[...]   # (C, S) f32

    # ---------------- fused q/k/v 1x1 projection ----------------
    # Wqkv is (3C, C) bf16 with Wq already scaled by 1/sqrt(hd).
    xn_b = xn.astype(jnp.bfloat16)
    qkv = jnp.dot(wqkv_ref[...], xn_b,
                  preferred_element_type=jnp.float32)                # (3C, S) f32
    qkv_b = qkv.astype(jnp.bfloat16)

    # ---------------- per-head attention with fused Wo + residual ----------------
    out = x                                                           # f32 (C, S) accumulator
    for h in range(num_heads):
        lo = h * hd
        q_t = qkv_b[lo:lo + hd, :]                                    # (hd, S) sublane-aligned
        k_t = qkv_b[C + lo:C + lo + hd, :]                            # (hd, S)
        v_t = qkv_b[2 * C + lo:2 * C + lo + hd, :]                    # (hd, S)

        # scores^T: keys on sublanes, queries on lanes (scale folded into Wq).
        scores_t = lax.dot_general(
            k_t, q_t, (((0,), (0,)), ((), ())),
            preferred_element_type=jnp.float32)                       # (S_k, S_q) f32

        # softmax over keys (axis 0); max/sum in f32, reciprocal on the EUP.
        m = jnp.max(scores_t, axis=0, keepdims=True)                  # (1, S_q)
        e = jnp.exp(scores_t - m)
        p = e * pl.reciprocal(jnp.sum(e, axis=0, keepdims=True), approx=True)

        # ctx^T = V^T @ P  (standard matmul, no transposes materialized)
        ctx_t = jnp.dot(v_t, p.astype(jnp.bfloat16),
                        preferred_element_type=jnp.float32)           # (hd, S_q) f32

        # fused final 1x1 projection: out += Wo[:, lo:lo+hd] @ ctx^T
        out = out + jnp.dot(wo_ref[h], ctx_t.astype(jnp.bfloat16),
                            preferred_element_type=jnp.float32)       # (C, S)

    o_ref[0] = out


def multiheaded_attention_fm(x_nchw, gamma, beta, wq, wk, wv, wo, num_heads):
    """x_nchw: (B, C, H, W) f32; conv weights wq/wk/wv/wo: (C_out, C_in) f32."""
    B, C, H, W = x_nchw.shape
    S = H * W
    assert C % NUM_GROUPS == 0 and C % num_heads == 0
    hd = C // num_heads
    gs = C // NUM_GROUPS

    # Native channel-major layout: only a free reshape (no transpose).
    x_cs = x_nchw.reshape(B, C, S)

    # Group-averaging matrix: A[i, j] = 1/(gs*S) if channels i, j share a group.
    grp_id = jnp.arange(C) // gs
    avg = (grp_id[:, None] == grp_id[None, :]).astype(jnp.float32) / float(gs * S)

    # Fuse q/k/v weights (fold 1/sqrt(hd) into Wq); bf16 MXU inputs.
    scale = 1.0 / float(hd) ** 0.5
    wqkv = jnp.concatenate([wq * scale, wk, wv], axis=0).astype(jnp.bfloat16)   # (3C, C)
    # Wo split per head along its input-channel (column) axis: (num_heads, C, hd).
    wo_heads = wo.reshape(C, num_heads, hd).transpose(1, 0, 2).astype(jnp.bfloat16)

    kernel = functools.partial(_mha_fm_kernel, num_heads=num_heads)
    full = lambda shape: pl.BlockSpec(shape, lambda b: tuple(0 for _ in shape))

    out_cs = pl.pallas_call(
        kernel,
        out_shape=jax.ShapeDtypeStruct((B, C, S), jnp.float32),
        grid_spec=pltpu.PrefetchScalarGridSpec(
            num_scalar_prefetch=0,
            grid=(B,),
            in_specs=[
                pl.BlockSpec((1, C, S), lambda b: (b, 0, 0)),   # x (per-sample block)
                full((C, 1)),                                    # gamma (column)
                full((C, 1)),                                    # beta (column)
                full((C, C)),                                    # group-average matrix
                full((3 * C, C)),                                # fused Wqkv (bf16)
                full((num_heads, C, hd)),                        # Wo per head (bf16)
            ],
            out_specs=pl.BlockSpec((1, C, S), lambda b: (b, 0, 0)),
        ),
        compiler_params=pltpu.CompilerParams(
            dimension_semantics=("parallel",),
            vmem_limit_bytes=64 * 1024 * 1024),
    )(x_cs, gamma.reshape(C, 1), beta.reshape(C, 1), avg, wqkv, wo_heads)

    # Back to NCHW: free reshape only.
    return out_cs.reshape(B, C, H, W)


def _reference(x, gamma, beta, wq, wk, wv, wo, num_heads):
    """Pure-JAX f32 reproduction of the PyTorch forward (NCHW)."""
    B, C, H, W = x.shape
    xg = x.reshape(B, NUM_GROUPS, C // NUM_GROUPS, H, W)
    mean = xg.mean(axis=(2, 3, 4), keepdims=True)
    var = xg.var(axis=(2, 3, 4), keepdims=True)
    xn = ((xg - mean) / jnp.sqrt(var + EPS)).reshape(B, C, H, W)
    xn = xn * gamma[None, :, None, None] + beta[None, :, None, None]

    conv = lambda t, w: jnp.einsum('bchw,oc->bohw', t, w)
    q, k, v = conv(xn, wq), conv(xn, wk), conv(xn, wv)

    S = H * W
    hd = C // num_heads
    to_heads = lambda t: t.transpose(0, 2, 3, 1).reshape(B, S, num_heads, hd).transpose(0, 2, 1, 3)
    qh, kh, vh = to_heads(q), to_heads(k), to_heads(v)
    scores = jnp.einsum('bhqd,bhkd->bhqk', qh, kh) / jnp.sqrt(jnp.float32(hd))
    attn = jax.nn.softmax(scores, axis=-1)
    ctx = jnp.einsum('bhqk,bhkd->bhqd', attn, vh)
    ctx = ctx.transpose(0, 2, 1, 3).reshape(B, H, W, C).transpose(0, 3, 1, 2)
    return conv(ctx, wo) + x


if __name__ == "__main__":
    B, C, H, W = 2, 64, 8, 8      # embed_ch=64 (divisible by 32 groups), 8x8 feature map
    num_heads = 4

    key = jax.random.PRNGKey(0)
    ks = jax.random.split(key, 7)
    x = jax.random.normal(ks[0], (B, C, H, W), dtype=jnp.float32)
    # GroupNorm affine params (PyTorch default init is ones/zeros; perturb for a non-trivial test)
    gamma = 1.0 + 0.1 * jax.random.normal(ks[1], (C,), dtype=jnp.float32)
    beta = 0.1 * jax.random.normal(ks[2], (C,), dtype=jnp.float32)
    # 1x1 conv weights (C_out, C_in), bias=False
    scale = 1.0 / jnp.sqrt(jnp.float32(C))
    wq = scale * jax.random.normal(ks[3], (C, C), dtype=jnp.float32)
    wk = scale * jax.random.normal(ks[4], (C, C), dtype=jnp.float32)
    wv = scale * jax.random.normal(ks[5], (C, C), dtype=jnp.float32)
    wo = scale * jax.random.normal(ks[6], (C, C), dtype=jnp.float32)

    out = multiheaded_attention_fm(x, gamma, beta, wq, wk, wv, wo, num_heads)
    out = jax.block_until_ready(out)

    ref = _reference(x, gamma, beta, wq, wk, wv, wo, num_heads)
    assert out.shape == x.shape
    # bf16 MXU inputs with f32 accumulation: tolerance relaxed accordingly vs f32 ref.
    err = float(jnp.max(jnp.abs(out - ref)))
    assert err < 5e-2, f"max abs err {err}"
    print("KERNEL_OK")
</pallas_src>

<mosaic_0001>
module attributes {stable_mosaic.version = 11 : i64} {
  func.func @_mha_fm_kernel(%arg0: i32, %arg1: memref<1x64x64xf32, #tpu.memory_space<vmem>>, %arg2: memref<64x1xf32, #tpu.memory_space<vmem>>, %arg3: memref<64x1xf32, #tpu.memory_space<vmem>>, %arg4: memref<64x64xf32, #tpu.memory_space<vmem>>, %arg5: memref<192x64xbf16, #tpu.memory_space<vmem>>, %arg6: memref<4x64x16xbf16, #tpu.memory_space<vmem>>, %arg7: memref<1x64x64xf32, #tpu.memory_space<vmem>>) attributes {dimension_semantics = [#tpu.dimension_semantics<parallel>], iteration_bounds = array<i64: 2>, scalar_prefetch = 0 : i64, scratch_operands = 0 : i64, tpu.core_type = #tpu.core_type<tc>, window_params = [{transform_indices = @transform_0, window_bounds = array<i64: 1, 64, 64>}, {pipeline_mode = #tpu.pipeline_mode<synchronous>, transform_indices = @transform_1, window_bounds = array<i64: 64, 1>}, {pipeline_mode = #tpu.pipeline_mode<synchronous>, transform_indices = @transform_2, window_bounds = array<i64: 64, 1>}, {pipeline_mode = #tpu.pipeline_mode<synchronous>, transform_indices = @transform_3, window_bounds = array<i64: 64, 64>}, {pipeline_mode = #tpu.pipeline_mode<synchronous>, transform_indices = @transform_4, window_bounds = array<i64: 192, 64>}, {pipeline_mode = #tpu.pipeline_mode<synchronous>, transform_indices = @transform_5, window_bounds = array<i64: 4, 64, 16>}, {transform_indices = @transform_6, window_bounds = array<i64: 1, 64, 64>}]} {
    %c0 = arith.constant 0 : index
    %c0_0 = arith.constant 0 : index
    %c0_1 = arith.constant 0 : index
    %0 = vector.load %arg1[%c0, %c0_0, %c0_1] : memref<1x64x64xf32, #tpu.memory_space<vmem>>, vector<1x64x64xf32>
    %1 = vector.shape_cast %0 : vector<1x64x64xf32> to vector<64x64xf32>
    %cst = arith.constant dense<0.000000e+00> : vector<64xf32>
    %2 = vector.multi_reduction <add>, %1, %cst [1] : vector<64x64xf32> to vector<64xf32>
    %3 = vector.shape_cast %2 : vector<64xf32> to vector<64x1xf32>
    %4 = arith.mulf %1, %1 : vector<64x64xf32>
    %cst_2 = arith.constant dense<0.000000e+00> : vector<64xf32>
    %5 = vector.multi_reduction <add>, %4, %cst_2 [1] : vector<64x64xf32> to vector<64xf32>
    %6 = vector.shape_cast %5 : vector<64xf32> to vector<64x1xf32>
    %c0_3 = arith.constant 0 : index
    %c0_4 = arith.constant 0 : index
    %7 = vector.load %arg4[%c0_3, %c0_4] : memref<64x64xf32, #tpu.memory_space<vmem>>, vector<64x64xf32>
    %cst_5 = arith.constant dense<0.000000e+00> : vector<64x1xf32>
    %8 = tpu.matmul %7, %3, %cst_5 {dimension_numbers = #tpu.dot_dimension_numbers<[1], [0], [0], [1], [0, 0, 1, 1], [], []>} : vector<64x64xf32>, vector<64x1xf32>, vector<64x1xf32> -> vector<64x1xf32>
    %c0_6 = arith.constant 0 : index
    %c0_7 = arith.constant 0 : index
    %9 = vector.load %arg4[%c0_6, %c0_7] : memref<64x64xf32, #tpu.memory_space<vmem>>, vector<64x64xf32>
    %cst_8 = arith.constant dense<0.000000e+00> : vector<64x1xf32>
    %10 = tpu.matmul %9, %6, %cst_8 {dimension_numbers = #tpu.dot_dimension_numbers<[1], [0], [0], [1], [0, 0, 1, 1], [], []>} : vector<64x64xf32>, vector<64x1xf32>, vector<64x1xf32> -> vector<64x1xf32>
    %11 = arith.mulf %8, %8 : vector<64x1xf32>
    %12 = arith.subf %10, %11 : vector<64x1xf32>
    %cst_9 = arith.constant 9.99999974E-6 : f32
    %13 = vector.broadcast %cst_9 : f32 to vector<64x1xf32>
    %14 = arith.addf %12, %13 : vector<64x1xf32>
    %15 = math.rsqrt %14 : vector<64x1xf32>
    %16 = vector.broadcast %8 : vector<64x1xf32> to vector<64x64xf32>
    %17 = arith.subf %1, %16 : vector<64x64xf32>
    %c0_10 = arith.constant 0 : index
    %c0_11 = arith.constant 0 : index
    %18 = vector.load %arg2[%c0_10, %c0_11] : memref<64x1xf32, #tpu.memory_space<vmem>>, vector<64x1xf32>
    %19 = arith.mulf %15, %18 : vector<64x1xf32>
    %20 = vector.broadcast %19 : vector<64x1xf32> to vector<64x64xf32>
    %21 = arith.mulf %17, %20 : vector<64x64xf32>
    %c0_12 = arith.constant 0 : index
    %c0_13 = arith.constant 0 : index
    %22 = vector.load %arg3[%c0_12, %c0_13] : memref<64x1xf32, #tpu.memory_space<vmem>>, vector<64x1xf32>
    %23 = vector.broadcast %22 : vector<64x1xf32> to vector<64x64xf32>
    %24 = arith.addf %21, %23 : vector<64x64xf32>
    %25 = arith.truncf %24 : vector<64x64xf32> to vector<64x64xbf16>
    %c0_14 = arith.constant 0 : index
    %c0_15 = arith.constant 0 : index
    %26 = vector.load %arg5[%c0_14, %c0_15] : memref<192x64xbf16, #tpu.memory_space<vmem>>, vector<192x64xbf16>
    %cst_16 = arith.constant dense<0.000000e+00> : vector<192x64xf32>
    %27 = tpu.matmul %26, %25, %cst_16 {dimension_numbers = #tpu.dot_dimension_numbers<[1], [0], [0], [1], [0, 0, 1, 1], [], []>} : vector<192x64xbf16>, vector<64x64xbf16>, vector<192x64xf32> -> vector<192x64xf32>
    %28 = arith.truncf %27 : vector<192x64xf32> to vector<192x64xbf16>
    %29 = vector.extract_strided_slice %28 {offsets = [0, 0], sizes = [16, 64], strides = [1, 1]} : vector<192x64xbf16> to vector<16x64xbf16>
    %30 = vector.extract_strided_slice %28 {offsets = [64, 0], sizes = [16, 64], strides = [1, 1]} : vector<192x64xbf16> to vector<16x64xbf16>
    %31 = vector.extract_strided_slice %28 {offsets = [128, 0], sizes = [16, 64], strides = [1, 1]} : vector<192x64xbf16> to vector<16x64xbf16>
    %cst_17 = arith.constant dense<0.000000e+00> : vector<64x64xf32>
    %32 = tpu.matmul %30, %29, %cst_17 {dimension_numbers = #tpu.dot_dimension_numbers<[0], [0], [1], [1], [0, 1, 1, 1], [], []>} : vector<16x64xbf16>, vector<16x64xbf16>, vector<64x64xf32> -> vector<64x64xf32>
    %cst_18 = arith.constant dense<0xFF800000> : vector<64xf32>
    %33 = vector.multi_reduction <maximumf>, %32, %cst_18 [0] : vector<64x64xf32> to vector<64xf32>
    %34 = vector.shape_cast %33 : vector<64xf32> to vector<1x64xf32>
    %35 = vector.broadcast %34 : vector<1x64xf32> to vector<64x64xf32>
    %36 = arith.subf %32, %35 : vector<64x64xf32>
    %37 = math.exp %36 : vector<64x64xf32>
    %cst_19 = arith.constant dense<0.000000e+00> : vector<64xf32>
    %38 = vector.multi_reduction <add>, %37, %cst_19 [0] : vector<64x64xf32> to vector<64xf32>
    %39 = vector.shape_cast %38 : vector<64xf32> to vector<1x64xf32>
    %40 = tpu.reciprocal %39 {approx = true} : vector<1x64xf32> -> vector<1x64xf32>
    %41 = vector.broadcast %40 : vector<1x64xf32> to vector<64x64xf32>
    %42 = arith.mulf %37, %41 : vector<64x64xf32>
    %43 = arith.truncf %42 : vector<64x64xf32> to vector<64x64xbf16>
    %cst_20 = arith.constant dense<0.000000e+00> : vector<16x64xf32>
    %44 = tpu.matmul %31, %43, %cst_20 {dimension_numbers = #tpu.dot_dimension_numbers<[1], [0], [0], [1], [0, 0, 1, 1], [], []>} : vector<16x64xbf16>, vector<64x64xbf16>, vector<16x64xf32> -> vector<16x64xf32>
    %c0_21 = arith.constant 0 : index
    %c0_22 = arith.constant 0 : index
    %c0_23 = arith.constant 0 : index
    %45 = vector.load %arg6[%c0_21, %c0_22, %c0_23] : memref<4x64x16xbf16, #tpu.memory_space<vmem>>, vector<1x64x16xbf16>
    %46 = vector.shape_cast %45 : vector<1x64x16xbf16> to vector<64x16xbf16>
    %47 = arith.truncf %44 : vector<16x64xf32> to vector<16x64xbf16>
    %cst_24 = arith.constant dense<0.000000e+00> : vector<64x64xf32>
    %48 = tpu.matmul %46, %47, %cst_24 {dimension_numbers = #tpu.dot_dimension_numbers<[1], [0], [0], [1], [0, 0, 1, 1], [], []>} : vector<64x16xbf16>, vector<16x64xbf16>, vector<64x64xf32> -> vector<64x64xf32>
    %49 = arith.addf %1, %48 : vector<64x64xf32>
    %50 = vector.extract_strided_slice %28 {offsets = [16, 0], sizes = [16, 64], strides = [1, 1]} : vector<192x64xbf16> to vector<16x64xbf16>
    %51 = vector.extract_strided_slice %28 {offsets = [80, 0], sizes = [16, 64], strides = [1, 1]} : vector<192x64xbf16> to vector<16x64xbf16>
    %52 = vector.extract_strided_slice %28 {offsets = [144, 0], sizes = [16, 64], strides = [1, 1]} : vector<192x64xbf16> to vector<16x64xbf16>
    %cst_25 = arith.constant dense<0.000000e+00> : vector<64x64xf32>
    %53 = tpu.matmul %51, %50, %cst_25 {dimension_numbers = #tpu.dot_dimension_numbers<[0], [0], [1], [1], [0, 1, 1, 1], [], []>} : vector<16x64xbf16>, vector<16x64xbf16>, vector<64x64xf32> -> vector<64x64xf32>
    %cst_26 = arith.constant dense<0xFF800000> : vector<64xf32>
    %54 = vector.multi_reduction <maximumf>, %53, %cst_26 [0] : vector<64x64xf32> to vector<64xf32>
    %55 = vector.shape_cast %54 : vector<64xf32> to vector<1x64xf32>
    %56 = vector.broadcast %55 : vector<1x64xf32> to vector<64x64xf32>
    %57 = arith.subf %53, %56 : vector<64x64xf32>
    %58 = math.exp %57 : vector<64x64xf32>
    %cst_27 = arith.constant dense<0.000000e+00> : vector<64xf32>
    %59 = vector.multi_reduction <add>, %58, %cst_27 [0] : vector<64x64xf32> to vector<64xf32>
    %60 = vector.shape_cast %59 : vector<64xf32> to vector<1x64xf32>
    %61 = tpu.reciprocal %60 {approx = true} : vector<1x64xf32> -> vector<1x64xf32>
    %62 = vector.broadcast %61 : vector<1x64xf32> to vector<64x64xf32>
    %63 = arith.mulf %58, %62 : vector<64x64xf32>
    %64 = arith.truncf %63 : vector<64x64xf32> to vector<64x64xbf16>
    %cst_28 = arith.constant dense<0.000000e+00> : vector<16x64xf32>
    %65 = tpu.matmul %52, %64, %cst_28 {dimension_numbers = #tpu.dot_dimension_numbers<[1], [0], [0], [1], [0, 0, 1, 1], [], []>} : vector<16x64xbf16>, vector<64x64xbf16>, vector<16x64xf32> -> vector<16x64xf32>
    %c1 = arith.constant 1 : index
    %c0_29 = arith.constant 0 : index
    %c0_30 = arith.constant 0 : index
    %66 = vector.load %arg6[%c1, %c0_29, %c0_30] : memref<4x64x16xbf16, #tpu.memory_space<vmem>>, vector<1x64x16xbf16>
    %67 = vector.shape_cast %66 : vector<1x64x16xbf16> to vector<64x16xbf16>
    %68 = arith.truncf %65 : vector<16x64xf32> to vector<16x64xbf16>
    %cst_31 = arith.constant dense<0.000000e+00> : vector<64x64xf32>
    %69 = tpu.matmul %67, %68, %cst_31 {dimension_numbers = #tpu.dot_dimension_numbers<[1], [0], [0], [1], [0, 0, 1, 1], [], []>} : vector<64x16xbf16>, vector<16x64xbf16>, vector<64x64xf32> -> vector<64x64xf32>
    %70 = arith.addf %49, %69 : vector<64x64xf32>
    %71 = vector.extract_strided_slice %28 {offsets = [32, 0], sizes = [16, 64], strides = [1, 1]} : vector<192x64xbf16> to vector<16x64xbf16>
    %72 = vector.extract_strided_slice %28 {offsets = [96, 0], sizes = [16, 64], strides = [1, 1]} : vector<192x64xbf16> to vector<16x64xbf16>
    %73 = vector.extract_strided_slice %28 {offsets = [160, 0], sizes = [16, 64], strides = [1, 1]} : vector<192x64xbf16> to vector<16x64xbf16>
    %cst_32 = arith.constant dense<0.000000e+00> : vector<64x64xf32>
    %74 = tpu.matmul %72, %71, %cst_32 {dimension_numbers = #tpu.dot_dimension_numbers<[0], [0], [1], [1], [0, 1, 1, 1], [], []>} : vector<16x64xbf16>, vector<16x64xbf16>, vector<64x64xf32> -> vector<64x64xf32>
    %cst_33 = arith.constant dense<0xFF800000> : vector<64xf32>
    %75 = vector.multi_reduction <maximumf>, %74, %cst_33 [0] : vector<64x64xf32> to vector<64xf32>
    %76 = vector.shape_cast %75 : vector<64xf32> to vector<1x64xf32>
    %77 = vector.broadcast %76 : vector<1x64xf32> to vector<64x64xf32>
    %78 = arith.subf %74, %77 : vector<64x64xf32>
    %79 = math.exp %78 : vector<64x64xf32>
    %cst_34 = arith.constant dense<0.000000e+00> : vector<64xf32>
    %80 = vector.multi_reduction <add>, %79, %cst_34 [0] : vector<64x64xf32> to vector<64xf32>
    %81 = vector.shape_cast %80 : vector<64xf32> to vector<1x64xf32>
    %82 = tpu.reciprocal %81 {approx = true} : vector<1x64xf32> -> vector<1x64xf32>
    %83 = vector.broadcast %82 : vector<1x64xf32> to vector<64x64xf32>
    %84 = arith.mulf %79, %83 : vector<64x64xf32>
    %85 = arith.truncf %84 : vector<64x64xf32> to vector<64x64xbf16>
    %cst_35 = arith.constant dense<0.000000e+00> : vector<16x64xf32>
    %86 = tpu.matmul %73, %85, %cst_35 {dimension_numbers = #tpu.dot_dimension_numbers<[1], [0], [0], [1], [0, 0, 1, 1], [], []>} : vector<16x64xbf16>, vector<64x64xbf16>, vector<16x64xf32> -> vector<16x64xf32>
    %c2 = arith.constant 2 : index
    %c0_36 = arith.constant 0 : index
    %c0_37 = arith.constant 0 : index
    %87 = vector.load %arg6[%c2, %c0_36, %c0_37] : memref<4x64x16xbf16, #tpu.memory_space<vmem>>, vector<1x64x16xbf16>
    %88 = vector.shape_cast %87 : vector<1x64x16xbf16> to vector<64x16xbf16>
    %89 = arith.truncf %86 : vector<16x64xf32> to vector<16x64xbf16>
    %cst_38 = arith.constant dense<0.000000e+00> : vector<64x64xf32>
    %90 = tpu.matmul %88, %89, %cst_38 {dimension_numbers = #tpu.dot_dimension_numbers<[1], [0], [0], [1], [0, 0, 1, 1], [], []>} : vector<64x16xbf16>, vector<16x64xbf16>, vector<64x64xf32> -> vector<64x64xf32>
    %91 = arith.addf %70, %90 : vector<64x64xf32>
    %92 = vector.extract_strided_slice %28 {offsets = [48, 0], sizes = [16, 64], strides = [1, 1]} : vector<192x64xbf16> to vector<16x64xbf16>
    %93 = vector.extract_strided_slice %28 {offsets = [112, 0], sizes = [16, 64], strides = [1, 1]} : vector<192x64xbf16> to vector<16x64xbf16>
    %94 = vector.extract_strided_slice %28 {offsets = [176, 0], sizes = [16, 64], strides = [1, 1]} : vector<192x64xbf16> to vector<16x64xbf16>
    %cst_39 = arith.constant dense<0.000000e+00> : vector<64x64xf32>
    %95 = tpu.matmul %93, %92, %cst_39 {dimension_numbers = #tpu.dot_dimension_numbers<[0], [0], [1], [1], [0, 1, 1, 1], [], []>} : vector<16x64xbf16>, vector<16x64xbf16>, vector<64x64xf32> -> vector<64x64xf32>
    %cst_40 = arith.constant dense<0xFF800000> : vector<64xf32>
    %96 = vector.multi_reduction <maximumf>, %95, %cst_40 [0] : vector<64x64xf32> to vector<64xf32>
    %97 = vector.shape_cast %96 : vector<64xf32> to vector<1x64xf32>
    %98 = vector.broadcast %97 : vector<1x64xf32> to vector<64x64xf32>
    %99 = arith.subf %95, %98 : vector<64x64xf32>
    %100 = math.exp %99 : vector<64x64xf32>
    %cst_41 = arith.constant dense<0.000000e+00> : vector<64xf32>
    %101 = vector.multi_reduction <add>, %100, %cst_41 [0] : vector<64x64xf32> to vector<64xf32>
    %102 = vector.shape_cast %101 : vector<64xf32> to vector<1x64xf32>
    %103 = tpu.reciprocal %102 {approx = true} : vector<1x64xf32> -> vector<1x64xf32>
    %104 = vector.broadcast %103 : vector<1x64xf32> to vector<64x64xf32>
    %105 = arith.mulf %100, %104 : vector<64x64xf32>
    %106 = arith.truncf %105 : vector<64x64xf32> to vector<64x64xbf16>
    %cst_42 = arith.constant dense<0.000000e+00> : vector<16x64xf32>
    %107 = tpu.matmul %94, %106, %cst_42 {dimension_numbers = #tpu.dot_dimension_numbers<[1], [0], [0], [1], [0, 0, 1, 1], [], []>} : vector<16x64xbf16>, vector<64x64xbf16>, vector<16x64xf32> -> vector<16x64xf32>
    %c3 = arith.constant 3 : index
    %c0_43 = arith.constant 0 : index
    %c0_44 = arith.constant 0 : index
    %108 = vector.load %arg6[%c3, %c0_43, %c0_44] : memref<4x64x16xbf16, #tpu.memory_space<vmem>>, vector<1x64x16xbf16>
    %109 = vector.shape_cast %108 : vector<1x64x16xbf16> to vector<64x16xbf16>
    %110 = arith.truncf %107 : vector<16x64xf32> to vector<16x64xbf16>
    %cst_45 = arith.constant dense<0.000000e+00> : vector<64x64xf32>
    %111 = tpu.matmul %109, %110, %cst_45 {dimension_numbers = #tpu.dot_dimension_numbers<[1], [0], [0], [1], [0, 0, 1, 1], [], []>} : vector<64x16xbf16>, vector<16x64xbf16>, vector<64x64xf32> -> vector<64x64xf32>
    %112 = arith.addf %91, %111 : vector<64x64xf32>
    %c0_46 = arith.constant 0 : index
    %c0_47 = arith.constant 0 : index
    %c0_48 = arith.constant 0 : index
    %113 = vector.load %arg7[%c0_46, %c0_47, %c0_48] : memref<1x64x64xf32, #tpu.memory_space<vmem>>, vector<1x64x64xf32>
    %114 = vector.shape_cast %113 : vector<1x64x64xf32> to vector<64x64xf32>
    %115 = vector.shape_cast %112 : vector<64x64xf32> to vector<1x64x64xf32>
    tpu.vector_store %arg7[%c0_46, %c0_47, %c0_48], %115 {strides = array<i32>} : memref<1x64x64xf32, #tpu.memory_space<vmem>>, vector<1x64x64xf32>,
    return
  }
  func.func @transform_0(%arg0: i32) -> (i32, i32, i32) {
    %c0_i32 = arith.constant 0 : i32
    %c0_i32_0 = arith.constant 0 : i32
    %c0_i32_1 = arith.constant 0 : i32
    return %arg0, %c0_i32, %c0_i32_0 : i32, i32, i32
  }
  func.func @transform_1(%arg0: i32) -> (i32, i32) {
    %c0_i32 = arith.constant 0 : i32
    %c0_i32_0 = arith.constant 0 : i32
    %c0_i32_1 = arith.constant 0 : i32
    return %c0_i32, %c0_i32_0 : i32, i32
  }
  func.func @transform_2(%arg0: i32) -> (i32, i32) {
    %c0_i32 = arith.constant 0 : i32
    %c0_i32_0 = arith.constant 0 : i32
    %c0_i32_1 = arith.constant 0 : i32
    return %c0_i32, %c0_i32_0 : i32, i32
  }
  func.func @transform_3(%arg0: i32) -> (i32, i32) {
    %c0_i32 = arith.constant 0 : i32
    %c0_i32_0 = arith.constant 0 : i32
    %c0_i32_1 = arith.constant 0 : i32
    return %c0_i32, %c0_i32_0 : i32, i32
  }
  func.func @transform_4(%arg0: i32) -> (i32, i32) {
    %c0_i32 = arith.constant 0 : i32
    %c0_i32_0 = arith.constant 0 : i32
    %c0_i32_1 = arith.constant 0 : i32
    return %c0_i32, %c0_i32_0 : i32, i32
  }
  func.func @transform_5(%arg0: i32) -> (i32, i32, i32) {
    %c0_i32 = arith.constant 0 : i32
    %c0_i32_0 = arith.constant 0 : i32
    %c0_i32_1 = arith.constant 0 : i32
    %c0_i32_2 = arith.constant 0 : i32
    return %c0_i32, %c0_i32_0, %c0_i32_1 : i32, i32, i32
  }
  func.func @transform_6(%arg0: i32) -> (i32, i32, i32) {
    %c0_i32 = arith.constant 0 : i32
    %c0_i32_0 = arith.constant 0 : i32
    %c0_i32_1 = arith.constant 0 : i32
    return %arg0, %c0_i32, %c0_i32_0 : i32, i32, i32
  }
}

</mosaic_0001>

<bundles_post_ra>
// kernel: tpu_custom_call.1
= control target key start
LH: loop header
LB: loop body
LE: loop exit
PB: predicated region body
PF: predicated region fallthrough
CT: control target
= control target key end

     0   :  { %11 = vsyncpa [#allocation3], 0  ;;  %s3847_s0 = inlined_call_operand.vmem [shape: f32[2,64,64], index: 0, kind: input, shape index: {}]   ;;  %s3848_s1 = inlined_call_operand.vmem [shape: f32[64,1], index: 1, kind: input, shape index: {}]   ;;  %s3849_s2 = inlined_call_operand.vmem [shape: f32[64,1], index: 2, kind: input, shape index: {}]   ;;  %s3850_s3 = inlined_call_operand.vmem [shape: f32[64,64], index: 3, kind: input, shape index: {}]   ;;  %s3851_s4 = inlined_call_operand.vmem [shape: bf16[192,64], index: 4, kind: input, shape index: {}]   ;;  %s3852_s5 = inlined_call_operand.vmem [shape: bf16[4,64,16], index: 5, kind: input, shape index: {}]   ;;  %s3853_s6 = inlined_call_operand.hbm [shape: f32[2,64,64], index: 6, kind: output, shape index: {}]  }
   0x1   :  { %13 = vsyncpa [#allocation3 + $0x1], 0  ;;  %s3166_s21 = smov 0   ;;  %s3168_s22 = smov 0  }
   0x2   :  { %s3170_s23 = smov 0   ;;  %s3172_s24 = smov 0  }
   0x3 LB: > { %s3187_s25 = sadd.s32 4294967295, %s3123_s24   ;;  %s2431_s26 = sadd.s32 4294967294, %s3123_s24   ;;  %s3123_s24 = sphi %s3172_s24, %s3859_s24   ;;  %s3119_s23 = sphi %s3170_s23, %s3858_s23   ;;  %s3115_s22 = sphi %s3168_s22, %s3857_s22   ;;  %s3111_s21 = sphi %s3166_s21, %s3856_s21  }
   0x4   : > { %s3191_s27 = sadd.s32 1, %s3123_s24   ;;  %s157_s28 = sadd.s32 1, %s3119_s23 }
   0x5   : > { %s154_s29 = ssub.s32 %s3123_s24, %s3191_s27  ;;  %p167_p0 = scmp.ne.s32.totalorder %s3119_s23, %s3115_s22 }
   0x6   : > { %p155_p1 = scmp.eq.s32.totalorder %s154_s29, 0  ;;  %p168_p2 = scmp.eq.s32.totalorder %s3187_s25, 1 }
   0x7   : > { %p173_p3 = scmp.ne.s32.totalorder %s3115_s22, %s3111_s21  ;;  %p174_p4 = scmp.eq.s32.totalorder %s2431_s26, 1 }
   0x8   : > { %s3202_s30 = scalar_select %p155_p1, %s3119_s23, %s157_s28  }
   0x9   : > { %p3204_p5 = por %p168_p2, %p167_p0  ;;  %p3208_p6 = por %p174_p4, %p173_p3 }
   0xa   : > { %p2434_p7 = scmp.ge.s32.totalorder %s3123_s24, 1  ;;  %p215_p8 = scmp.lt.s32.totalorder %s3123_s24, 3 }
   0xc   : > { %p216_p9 = pnand %p2434_p7, %p215_p8 }
   0xd   : > { %p245_p10 = scmp.lt.s32.totalorder (!%p216_p9), %s3187_s25, 1  ;;  %s242_s19 = sand.u32 (!%p216_p9), 1, %s3115_s22  }
   0xe   : > { %219 = sbr.rel (%p216_p9) target bundleno = 2681 (0xa79), region = 44  ;;  %s2435_s20 = sshll.u32 (!%p216_p9), %s242_s19, 6 }
   0xf   : > { %s244_s26 = scalar_lea.vmem (!%p216_p9), [#allocation2], %s2435_s20  ;;  %s3128_s12 = smov (!%p216_p9), [#allocation2]  }
  0x10   : > { %s2369_s28 = sshll.u32 (!%p216_p9), %s244_s26, 4  ;;  %s3067_s14 = sshll.u32 (!%p216_p9), %s3128_s12, 4  ;;  %s3801_s28 = int_to_ptr.vmem [resolvable:$true] %s2369_s28  ;;  %s3068_s14 = int_to_ptr.vmem [resolvable:$false] %s3067_s14 }
  0x11   : > { %s3063_s11 = scalar_lea.vmem (!%p216_p9), %s3801_s28, 1024  ;;  %s3069_s15 = scalar_lea.vmem (!%p216_p9), %s3068_s14, 2048 }
  0x12   : > { %p3064_p11 = scmp.ne.s32.totalorder (!%p216_p9), %s3801_s28, %s3063_s11  ;;  %p3070_p0 = scmp.lt.s32.totalorder (!%p216_p9), %s3801_s28, %s3068_s14 }
  0x13   : > { %s246_s9 = scalar_select %p245_p10, %s3187_s25, 1  ;;  %vm259_vm0 = vcmask 523264   ;;  %v316_v32 = vld [vmem:[%s3850_s3] sm:$0xff]  ;;  %v708_v33 = vld [vmem:[%s3849_s2 + $0x30] sm:$0xff]  ;;  %v3125_v34 = vmov 0   ;;  %v709_v35 = vld [vmem:[%s3849_s2 + $0x38] sm:$0xff] }
  0x14   : > { %2685 = vmatprep.mubr.msk.f32.mxu0 %vm259_vm0, %v316_v32  ;;  %2713 = vmatprep.mubr.msk.f32.mxu1 %vm259_vm0, %v316_v32  ;;  %v317_v50 = vld [vmem:[%s3850_s3 + $0x8] sm:$0xff]  ;;  %v318_v51 = vld [vmem:[%s3850_s3 + $0x10] sm:$0xff]  ;;  %v319_v54 = vld [vmem:[%s3850_s3 + $0x18] sm:$0xff]  ;;  %vm1039_vm1 = vcmask 130048   ;;  %vm3127_vm2 = vmmov 0   ;;  %p3065_p12 = pnand %p3064_p11, %p3204_p5  ;;  %p3071_p1 = scmp.lt.s32.totalorder %s3069_s15, %s3063_s11 }
  0x15   : > { %s2559_s10 = sshll.u32 %s246_s9, 6  ;;  %2937 = vset.pattern.permute.xlu1 %v3125_v34  ;;  %2938 = vset.pattern.permute.xlu0 %v3125_v34  ;;  %v320_v55 = vld [vmem:[%s3850_s3 + $0x20] sm:$0xff]  ;;  %v321_v56 = vld [vmem:[%s3850_s3 + $0x28] sm:$0xff]  ;;  %v322_v57 = vld [vmem:[%s3850_s3 + $0x30] sm:$0xff] }
  0x16   : > { %s3219_s13 = scalar_lea.vmem %s3847_s0, %s2559_s10  ;;  %v323_v58 = vld [vmem:[%s3850_s3 + $0x38] sm:$0xff]  ;;  %v706_v59 = vld [vmem:[%s3849_s2 + $0x20] sm:$0xff]  ;;  %v707_v60 = vld [vmem:[%s3849_s2 + $0x28] sm:$0xff]  ;;  %p3066_p13 = pneg %p3065_p12 }
  0x17   : > { %v3222_v0 = vld [vmem:[%s3219_s13 + $0x38] sm:$0xff]  ;;  %v3225_v1 = vld [vmem:[%s3219_s13 + $0x28] sm:$0xff]  ;;  %v3228_v2 = vld [vmem:[%s3219_s13 + $0x30] sm:$0xff]  ;;  %p3072_p2 = por %p3071_p1, %p3070_p0 }
  0x18   : > { %v281_v3 = vsel %vm259_vm0, %v3222_v0, 0.0  ;;  %v275_v4 = vsel %vm259_vm0, %v3225_v1, 0.0  ;;  %v3235_v5 = vld [vmem:[%s3219_s13 + $0x20] sm:$0xff]  ;;  %v278_v6 = vsel %vm259_vm0, %v3228_v2, 0.0  ;;  %v290_v7 = vmul.f32 %v3228_v2, %v3228_v2  ;;  %v3246_v10 = vld [vmem:[%s3219_s13 + $0x18] sm:$0xff]  ;;  %v3253_v13 = vld [vmem:[%s3219_s13 + $0x10] sm:$0xff] }
  0x19   : > { %282 = vadd.xlane.f32.xlu0 %v281_v3  ;;  %276 = vadd.xlane.f32.xlu1 %v275_v4  ;;  %v272_v8 = vsel %vm259_vm0, %v3235_v5, 0.0  ;;  %v291_v9 = vmul.f32 %v3222_v0, %v3222_v0  ;;  %v289_v11 = vmul.f32 %v3225_v1, %v3225_v1  ;;  %v288_v12 = vmul.f32 %v3235_v5, %v3235_v5  ;;  %v3264_v20 = vld [vmem:[%s3219_s13 + $0x8] sm:$0xff]  ;;  %v3274_v25 = vld [vmem:[%s3219_s13] sm:$0xff]  ;;  %p3073_p3 = pnand %p3072_p2, %p3066_p13 }
  0x1a   : > { %v310_v14 = vsel %vm259_vm0, %v290_v7, 0.0  ;;  %v269_v15 = vsel %vm259_vm0, %v3246_v10, 0.0  ;;  %v266_v17 = vsel %vm259_vm0, %v3253_v13, 0.0  ;;  %v287_v21 = vmul.f32 %v3246_v10, %v3246_v10 }
  0x1b   : > { %v313_v16 = vsel %vm259_vm0, %v291_v9, 0.0  ;;  %v307_v18 = vsel %vm259_vm0, %v289_v11, 0.0  ;;  %v304_v19 = vsel %vm259_vm0, %v288_v12, 0.0  ;;  %v263_v23 = vsel %vm259_vm0, %v3264_v20, 0.0 }
  0x1c   : > { %v301_v22 = vsel %vm259_vm0, %v287_v21, 0.0  ;;  %v286_v24 = vmul.f32 %v3253_v13, %v3253_v13  ;;  %v260_v27 = vsel %vm259_vm0, %v3274_v25, 0.0  ;;  %v285_v28 = vmul.f32 %v3264_v20, %v3264_v20 }
  0x1d   : > { %279 = vadd.xlane.f32.xlu0 %v278_v6  ;;  %273 = vadd.xlane.f32.xlu1 %v272_v8  ;;  %v284_v29 = vmul.f32 %v3274_v25, %v3274_v25 }
  0x1e   : > { %v298_v26 = vsel %vm259_vm0, %v286_v24, 0.0  ;;  %v295_v30 = vsel %vm259_vm0, %v285_v28, 0.0 }
  0x1f   : > { %v292_v31 = vsel %vm259_vm0, %v284_v29, 0.0 }
  0x21   : > { %311 = vadd.xlane.f32.xlu0 %v310_v14  ;;  %314 = vadd.xlane.f32.xlu1 %v313_v16 }
  0x25   : > { %308 = vadd.xlane.f32.xlu0 %v307_v18  ;;  %270 = vadd.xlane.f32.xlu1 %v269_v15 }
  0x29   : > { %305 = vadd.xlane.f32.xlu0 %v304_v19  ;;  %267 = vadd.xlane.f32.xlu1 %v266_v17 }
  0x2d   : > { %302 = vadd.xlane.f32.xlu0 %v301_v22  ;;  %264 = vadd.xlane.f32.xlu1 %v263_v23 }
  0x31   : > { %299 = vadd.xlane.f32.xlu0 %v298_v26  ;;  %261 = vadd.xlane.f32.xlu1 %v260_v27 }
  0x35   : > { %296 = vadd.xlane.f32.xlu0 %v295_v30  ;;  %293 = vadd.xlane.f32.xlu1 %v292_v31 }
  0x46   : > { %742 = vperm.xlu1 %2937, %v708_v33  }
  0x4a   : > { %747 = vperm.xlu1 %2937, %v709_v35  }
  0x4b   : > { %737 = vperm.xlu0 %2938, %v707_v60  }
  0x4e   : > { %732 = vperm.xlu1 %2937, %v706_v59  }
  0xa2   : > { %v283_v36 = vpop.xlane.xlu0 %282  ;;  %v277_v37 = vpop.xlane.xlu1 %276 }
  0xa3   : > { %2669 = vmatprep.subr.mxu0 %v283_v36 }
  0xa4   : > { %2670 = vmatpush3.msra.mxu0 %v283_v36 }
  0xa6   : > { %v280_v38 = vpop.xlane.xlu0 %279  ;;  %v274_v39 = vpop.xlane.xlu1 %273 }
  0xa7   : > { %2671 = vmatprep.subr.mxu0 %v280_v38 }
  0xa8   : > { %2672 = vmatpush3.msra.mxu0 %v280_v38 }
  0xa9   : > { %2673 = vmatprep.subr.mxu0 %v277_v37 }
  0xaa   : > { %v312_v40 = vpop.xlane.xlu0 %311  ;;  %2674 = vmatpush3.msra.mxu0 %v277_v37  ;;  %v315_v41 = vpop.xlane.xlu1 %314 }
  0xab   : > { %2675 = vmatprep.subr.mxu0 %v274_v39  ;;  %2697 = vmatprep.subr.mxu1 %v315_v41 }
  0xac   : > { %2676 = vmatpush3.msra.mxu0 %v274_v39  ;;  %2698 = vmatpush3.msra.mxu1 %v315_v41 }
  0xad   : > { %2699 = vmatprep.subr.mxu1 %v312_v40 }
  0xae   : > { %v309_v42 = vpop.xlane.xlu0 %308  ;;  %2700 = vmatpush3.msra.mxu1 %v312_v40  ;;  %v271_v43 = vpop.xlane.xlu1 %270 }
  0xaf   : > { %2701 = vmatprep.subr.mxu1 %v309_v42  ;;  %2677 = vmatprep.subr.mxu0 %v271_v43 }
  0xb0   : > { %2702 = vmatpush3.msra.mxu1 %v309_v42  ;;  %2678 = vmatpush3.msra.mxu0 %v271_v43  ;;  %v641_v42 = vld [vmem:[%s3848_s1 + $0x18] sm:$0xff] }
  0xb2   : > { %v306_v44 = vpop.xlane.xlu0 %305  ;;  %v268_v45 = vpop.xlane.xlu1 %267 }
  0xb3   : > { %2703 = vmatprep.subr.mxu1 %v306_v44  ;;  %2679 = vmatprep.subr.mxu0 %v268_v45 }
  0xb4   : > { %2704 = vmatpush3.msra.mxu1 %v306_v44  ;;  %2680 = vmatpush3.msra.mxu0 %v268_v45  ;;  %v640_v44 = vld [vmem:[%s3848_s1 + $0x10] sm:$0xff] }
  0xb6   : > { %v303_v46 = vpop.xlane.xlu0 %302  ;;  %v265_v47 = vpop.xlane.xlu1 %264 }
  0xb7   : > { %2705 = vmatprep.subr.mxu1 %v303_v46  ;;  %2681 = vmatprep.subr.mxu0 %v265_v47 }
  0xb8   : > { %2706 = vmatpush3.msra.mxu1 %v303_v46  ;;  %2682 = vmatpush3.msra.mxu0 %v265_v47 }
  0xba   : > { %v300_v48 = vpop.xlane.xlu0 %299  ;;  %v262_v49 = vpop.xlane.xlu1 %261 }
  0xbb   : > { %2683 = vmatprep.subr.mxu0 %v262_v49  ;;  %2707 = vmatprep.subr.mxu1 %v300_v48 }
  0xbc   : > { %2684 = vmatpush3.msra.mxu0 %v262_v49  ;;  %2708 = vmatpush3.msra.mxu1 %v300_v48  ;;  %v643_v48 = vld [vmem:[%s3848_s1 + $0x28] sm:$0xff] }
  0xbd   : > { %2686 = vmatmul.mubr.msk.f32.vlgmr.msra.gmra.mxu0 %vm259_vm0, %v317_v50 }
  0xbe   : > { %v297_v52 = vpop.xlane.xlu0 %296  ;;  %2688 = vmatprep.mubr.msk.f32.mxu0 %vm259_vm0, %v318_v51  ;;  %v294_v53 = vpop.xlane.xlu1 %293 }
  0xbf   : > { %2709 = vmatprep.subr.mxu1 %v297_v52 }
  0xc0   : > { %2710 = vmatpush3.msra.mxu1 %v297_v52  ;;  %v642_v52 = vld [vmem:[%s3848_s1 + $0x20] sm:$0xff] }
  0xc1   : > { %2689 = vmatmul.mubr.msk.f32.gmra.mxu0 %vm259_vm0, %v319_v54  ;;  %2711 = vmatprep.subr.mxu1 %v294_v53 }
  0xc2   : > { %2712 = vmatpush3.msra.mxu1 %v294_v53  ;;  %2691 = vmatprep.mubr.msk.f32.mxu0 %vm259_vm0, %v320_v55 }
  0xc3   : > { %2714 = vmatmul.mubr.msk.f32.vlgmr.msra.gmra.mxu1 %vm259_vm0, %v317_v50 }
  0xc4   : > { %2716 = vmatprep.mubr.msk.f32.mxu1 %vm259_vm0, %v318_v51 }
  0xc5   : > { %2692 = vmatmul.mubr.msk.f32.gmra.mxu0 %vm259_vm0, %v321_v56 }
  0xc6   : > { %2694 = vmatprep.mubr.msk.f32.mxu0 %vm259_vm0, %v322_v57 }
  0xc7   : > { %2717 = vmatmul.mubr.msk.f32.gmra.mxu1 %vm259_vm0, %v319_v54 }
  0xc8   : > { %2719 = vmatprep.mubr.msk.f32.mxu1 %vm259_vm0, %v320_v55  ;;  %v645_v55 = vld [vmem:[%s3848_s1 + $0x38] sm:$0xff] }
  0xc9   : > { %2695 = vmatmul.mubr.msk.f32.gmra.mxu0 %vm259_vm0, %v323_v58 }
  0xcb   : > { %2720 = vmatmul.mubr.msk.f32.gmra.mxu1 %vm259_vm0, %v321_v56 }
  0xcc   : > { %2722 = vmatprep.mubr.msk.f32.mxu1 %vm259_vm0, %v322_v57 }
  0xcf   : > { %2723 = vmatmul.mubr.msk.f32.gmra.mxu1 %vm259_vm0, %v323_v58 }
 0x17d   : > { %v3337_v61 = vpop.f32.mrf.mxu0 }
 0x17e   : > { %v559_v28 = vmul.f32 %v3337_v61, %v3337_v61 }
 0x17f   : > { %v3339_v62 = vpop.f32.mrf.mxu0 }
 0x180   : > { %v558_v45 = vmul.f32 %v3339_v62, %v3339_v62 }
 0x181   : > { %v2690_v63 = vpop.f32.mrf.mxu0 }
 0x182   : > { %607 = vperm.xlu0 %2938, %v2690_v63   ;;  %v561_v6 = vmul.f32 %v2690_v63, %v2690_v63  ;;  %v705_v63 = vld [vmem:[%s3849_s2 + $0x18] sm:$0xff] }
 0x183   : > { %v424_v3 = vpop.f32.mrf.mxu0  ;;  %v2715_v4 = vpop.f32.mrf.mxu1 }
 0x184   : > { %602 = vperm.xlu1 %2937, %v424_v3   ;;  %v560_v12 = vmul.f32 %v424_v3, %v424_v3  ;;  %v567_v37 = vsub.f32 %v2715_v4, %v559_v28  ;;  %v644_v3 = vld [vmem:[%s3848_s1 + $0x30] sm:$0xff] }
 0x185   : > { %v519_v7 = vpop.f32.mrf.mxu1  ;;  %v2693_v8 = vpop.f32.mrf.mxu0 }
 0x186   : > { %v563_v14 = vmul.f32 %v2693_v8, %v2693_v8  ;;  %v575_v41 = vadd.f32 1e-05, %v567_v37  ;;  %v566_v49 = vsub.f32 %v519_v7, %v558_v45 }
 0x187   : > { %v2718_v9 = vpop.f32.mrf.mxu1  ;;  %v434_v11 = vpop.f32.mrf.mxu0 }
 0x188   : > { %v569_v15 = vsub.f32 %v2718_v9, %v561_v6  ;;  %617 = vperm.xlu1 %2937, %v2693_v8   ;;  %v562_v21 = vmul.f32 %v434_v11, %v434_v11  ;;  %v574_v56 = vadd.f32 1e-05, %v566_v49  ;;  %v639_v6 = vld [vmem:[%s3848_s1 + $0x8] sm:$0xff]  ;;  %v704_v9 = vld [vmem:[%s3849_s2 + $0x10] sm:$0xff] }
 0x189   : > { %v529_v16 = vpop.f32.mrf.mxu1  ;;  %v2696_v17 = vpop.f32.mrf.mxu0 }
 0x18a   : > { %v577_v18 = vadd.f32 1e-05, %v569_v15  ;;  %v568_v19 = vsub.f32 %v529_v16, %v560_v12  ;;  %v565_v27 = vmul.f32 %v2696_v17, %v2696_v17  ;;  %v638_v12 = vld [vmem:[%s3848_s1] sm:$0xff]  ;;  %v743_v16 = vpop.permute.xlu1 %742 }
 0x18b   : > { %v2721_v22 = vpop.f32.mrf.mxu1  ;;  %v444_v23 = vpop.f32.mrf.mxu0  ;;  %v702_v15 = vld [vmem:[%s3849_s2] sm:$0xff] }
 0x18c   : > { %2967 = vrsqrt.f32 %v577_v18  ;;  %v576_v24 = vadd.f32 1e-05, %v568_v19  ;;  %v571_v26 = vsub.f32 %v2721_v22, %v563_v14  ;;  %612 = vperm.xlu1 %2937, %v434_v11   ;;  %622 = vperm.xlu0 %2938, %v444_v23   ;;  %v564_v32 = vmul.f32 %v444_v23, %v444_v23 }
 0x18d   : > { %v539_v29 = vpop.f32.mrf.mxu1 }
 0x18e   : > { %2969 = vrsqrt.f32 %v576_v24  ;;  %v579_v30 = vadd.f32 1e-05, %v571_v26  ;;  %v570_v31 = vsub.f32 %v539_v29, %v562_v21  ;;  %v738_v21 = vpop.permute.xlu0 %737 }
 0x18f   : > { %v2724_v33 = vpop.f32.mrf.mxu1 }
 0x190   : > { %2971 = vrsqrt.f32 %v579_v30  ;;  %v578_v34 = vadd.f32 1e-05, %v570_v31  ;;  %v573_v35 = vsub.f32 %v2724_v33, %v565_v27  ;;  %627 = vperm.xlu1 %2937, %v2696_v17   ;;  %v748_v17 = vpop.permute.xlu1 %747 }
 0x191   : > { %v549_v36 = vpop.f32.mrf.mxu1 }
 0x192   : > { %2973 = vrsqrt.f32 %v578_v34  ;;  %v581_v38 = vadd.f32 1e-05, %v573_v35  ;;  %v572_v39 = vsub.f32 %v549_v36, %v564_v32 }
 0x194   : > { %2975 = vrsqrt.f32 %v581_v38  ;;  %v580_v40 = vadd.f32 1e-05, %v572_v39  ;;  %v733_v18 = vpop.permute.xlu1 %732 }
 0x196   : > { %2977 = vrsqrt.f32 %v580_v40 }
 0x197   : > { %2979 = vrsqrt.f32 %v575_v41 }
 0x198   : > { %2981 = vrsqrt.f32 %v574_v56 }
 0x199   : > { %v2968_v43 = vpop.eup %2967 }
 0x19a   : > { %v649_v46 = vmul.f32 %v2968_v43, %v641_v42 }
 0x19b   : > { %v2970_v47 = vpop.eup %2969 }
 0x19c   : > { %671 = vperm.xlu0 %2938, %v649_v46   ;;  %v648_v50 = vmul.f32 %v2970_v47, %v640_v44 }
 0x19d   : > { %v2972_v51 = vpop.eup %2971 }
 0x19e   : > { %666 = vperm.xlu1 %2937, %v648_v50   ;;  %v651_v53 = vmul.f32 %v2972_v51, %v643_v48 }
 0x19f   : > { %v2974_v54 = vpop.eup %2973 }
 0x1a0   : > { %681 = vperm.xlu0 %2938, %v651_v53   ;;  %v650_v57 = vmul.f32 %v2974_v54, %v642_v52 }
 0x1a1   : > { %v2976_v58 = vpop.eup %2975 }
 0x1a2   : > { %676 = vperm.xlu1 %2937, %v650_v57   ;;  %v653_v59 = vmul.f32 %v2976_v58, %v645_v55 }
 0x1a3   : > { %v2978_v60 = vpop.eup %2977 }
 0x1a4   : > { %597 = vperm.xlu0 %2938, %v3337_v61   ;;  %v2980_v4 = vpop.eup %2979  ;;  %v652_v7 = vmul.f32 %v2978_v60, %v644_v3  ;;  %v703_v61 = vld [vmem:[%s3849_s2 + $0x8] sm:$0xff] }
 0x1a5   : > { %v647_v8 = vmul.f32 %v2980_v4, %v639_v6  ;;  %v2982_v11 = vpop.eup %2981  ;;  %v2940_v6 = vld [vmem:[%s3851_s4 + $0x8] sm:$0xff]  }
 0x1a6   : > { %691 = vperm.xlu1 %2937, %v653_v59   ;;  %v646_v14 = vmul.f32 %v2982_v11, %v638_v12 }
 0x1a8   : > { %727 = vperm.xlu0 %2938, %v705_v63  }
 0x1aa   : > { %686 = vperm.xlu1 %2937, %v652_v7   ;;  %v2943_v7 = vld [vmem:[%s3851_s4 + $0x20] sm:$0xff]  }
 0x1ac   : > { %661 = vperm.xlu0 %2938, %v647_v8   ;;  %v2944_v8 = vld [vmem:[%s3851_s4 + $0x28] sm:$0xff]  }
 0x1ae   : > { %592 = vperm.xlu1 %2937, %v3339_v62   ;;  %v2939_v62 = vld [vmem:[%s3851_s4] sm:$0xff]  }
 0x1af   : > { %2733 = vmatprep.mubr.msk.bf16.mxu0 %vm259_vm0, %v2939_v62 }
 0x1b0   : > { %717 = vperm.xlu0 %2938, %v703_v61   ;;  %v2945_v61 = vld [vmem:[%s3851_s4 + $0x50] sm:$0xff]  }
 0x1b1   : > { %2753 = vmatprep.mubr.msk.bf16.mxu1 %vm259_vm0, %v2945_v61 }
 0x1b2   : > { %722 = vperm.xlu1 %2937, %v704_v9   ;;  %v2946_v9 = vld [vmem:[%s3851_s4 + $0x58] sm:$0xff]  }
 0x1b6   : > { %656 = vperm.xlu1 %2937, %v646_v14  }
 0x1ba   : > { %712 = vperm.xlu1 %2937, %v702_v15  }
 0x1fd   : > { %v608_v23 = vpop.permute.xlu0 %607 }
 0x1ff   : > { %v603_v19 = vpop.permute.xlu1 %602 }
 0x200   : > { %v632_v48 = vsub.f32 %v3253_v13, %v603_v19  ;;  %v2948_v19 = vld [vmem:[%s3851_s4 + $0x38] sm:$0xff]  }
 0x203   : > { %v618_v22 = vpop.permute.xlu1 %617 }
 0x204   : > { %v635_v36 = vsub.f32 %v3225_v1, %v618_v22 }
 0x207   : > { %v613_v24 = vpop.permute.xlu1 %612  ;;  %v623_v26 = vpop.permute.xlu0 %622 }
 0x208   : > { %v634_v34 = vsub.f32 %v3235_v5, %v613_v24  ;;  %v636_v37 = vsub.f32 %v3228_v2, %v623_v26  ;;  %v633_v5 = vsub.f32 %v3246_v10, %v608_v23 }
 0x20b   : > { %v628_v27 = vpop.permute.xlu1 %627 }
 0x20c   : > { %v637_v35 = vsub.f32 %v3222_v0, %v628_v27 }
 0x217   : > { %v672_v28 = vpop.permute.xlu0 %671 }
 0x218   : > { %v697_v50 = vmul.f32 %v672_v28, %v633_v5  ;;  %v2950_v28 = vld [vmem:[%s3851_s4 + $0x48] sm:$0xff]  }
 0x219   : > { %v667_v29 = vpop.permute.xlu1 %666 }
 0x21a   : > { %v696_v1 = vmul.f32 %v667_v29, %v632_v48 }
 0x21b   : > { %v682_v30 = vpop.permute.xlu0 %681 }
 0x21c   : > { %v699_v41 = vmul.f32 %v682_v30, %v635_v36 }
 0x21d   : > { %v677_v31 = vpop.permute.xlu1 %676 }
 0x21e   : > { %v698_v38 = vmul.f32 %v677_v31, %v634_v34  ;;  %v755_v49 = vadd.f32 %v738_v21, %v699_v41  ;;  %v2949_v21 = vld [vmem:[%s3851_s4 + $0x40] sm:$0xff]  }
 0x21f   : > { %v598_v32 = vpop.permute.xlu0 %597 }
 0x220   : > { %v754_v44 = vadd.f32 %v733_v18, %v698_v38  ;;  %v631_v10 = vsub.f32 %v3264_v20, %v598_v32  ;;  %v2941_v20 = vld [vmem:[%s3851_s4 + $0x10] sm:$0xff]  }
 0x221   : > { %v692_v33 = vpop.permute.xlu1 %691  ;;  %v2947_v18 = vld [vmem:[%s3851_s4 + $0x30] sm:$0xff]  }
 0x222   : > { %v701_v39 = vmul.f32 %v692_v33, %v637_v35  ;;  %v760_v51 = vpack.c.bf16 %v755_v49, %v754_v44  ;;  %v3126_v44 = vmov 0.0  }
 0x223   : > { %v728_v43 = vpop.permute.xlu0 %727 }
 0x224   : > { %v757_v45 = vadd.f32 %v748_v17, %v701_v39  ;;  %v753_v53 = vadd.f32 %v728_v43, %v697_v50 }
 0x225   : > { %v687_v40 = vpop.permute.xlu1 %686 }
 0x226   : > { %v700_v42 = vmul.f32 %v687_v40, %v636_v37 }
 0x227   : > { %v662_v2 = vpop.permute.xlu0 %661 }
 0x228   : > { %v756_v46 = vadd.f32 %v743_v16, %v700_v42  ;;  %v695_v58 = vmul.f32 %v662_v2, %v631_v10 }
 0x229   : > { %v593_v47 = vpop.permute.xlu1 %592 }
 0x22a   : > { %v761_v0 = vpack.c.bf16 %v757_v45, %v756_v46  ;;  %v630_v56 = vsub.f32 %v3274_v25, %v593_v47  ;;  %v2942_v25 = vld [vmem:[%s3851_s4 + $0x18] sm:$0xff]  }
 0x22b   : > { %v718_v57 = vpop.permute.xlu0 %717 }
 0x22c   : > { %2725 = vmatprep.subr.bf16.mxu0 %v761_v0  ;;  %2885 = vmatprep.subr.bf16.mxu1 %v761_v0  ;;  %v751_v63 = vadd.f32 %v718_v57, %v695_v58 }
 0x22d   : > { %2726 = vmatpush3.bf16.msra.mxu0 %v761_v0  ;;  %2889 = vmatpush3.bf16.msra.mxu1 %v761_v0  ;;  %v723_v52 = vpop.permute.xlu1 %722 }
 0x22e   : > { %v752_v54 = vadd.f32 %v723_v52, %v696_v1  ;;  %2727 = vmatprep.subr.bf16.mxu0 %v760_v51  ;;  %2886 = vmatprep.subr.bf16.mxu1 %v760_v51 }
 0x230   : > { %v759_v55 = vpack.c.bf16 %v753_v53, %v752_v54 }
 0x231   : > { %2728 = vmatpush3.bf16.msra.mxu0 %v760_v51  ;;  %2890 = vmatpush3.bf16.msra.mxu1 %v760_v51  ;;  %v657_v13 = vpop.permute.xlu1 %656 }
 0x232   : > { %2729 = vmatprep.subr.bf16.mxu0 %v759_v55  ;;  %2887 = vmatprep.subr.bf16.mxu1 %v759_v55  ;;  %v694_v59 = vmul.f32 %v657_v13, %v630_v56 }
 0x235   : > { %2730 = vmatpush3.bf16.msra.mxu0 %v759_v55  ;;  %2891 = vmatpush3.bf16.msra.mxu1 %v759_v55  ;;  %v713_v60 = vpop.permute.xlu1 %712 }
 0x236   : > { %v750_v3 = vadd.f32 %v713_v60, %v694_v59 }
 0x238   : > { %v758_v4 = vpack.c.bf16 %v751_v63, %v750_v3 }
 0x23a   : > { %2731 = vmatprep.subr.bf16.mxu0 %v758_v4  ;;  %2888 = vmatprep.subr.bf16.mxu1 %v758_v4 }
 0x23b   : > { %2732 = vmatpush3.bf16.msra.mxu0 %v758_v4  ;;  %2892 = vmatpush3.bf16.msra.mxu1 %v758_v4 }
 0x23c   : > { %2799 = vmatprep.subr.bf16.mxu0 %v3126_v44 }
 0x23e   : > { %2734 = vmatmul.mubr.msk.bf16.vlgmr.msra.gmra.mxu0 %vm259_vm0, %v2940_v6  ;;  %2754 = vmatmul.mubr.msk.bf16.vlgmr.msra.gmra.mxu1 %vm259_vm0, %v2946_v9 }
 0x23f   : > { %2737 = vmatprep.mubr.msk.bf16.mxu0 %vm259_vm0, %v2941_v20 }
 0x246   : > { %2738 = vmatmul.mubr.msk.bf16.gmra.mxu0 %vm259_vm0, %v2942_v25 }
 0x247   : > { %2741 = vmatprep.mubr.msk.bf16.mxu0 %vm259_vm0, %v2943_v7 }
 0x24e   : > { %2742 = vmatmul.mubr.msk.bf16.gmra.mxu0 %vm259_vm0, %v2944_v8 }
 0x24f   : > { %2745 = vmatprep.mubr.msk.bf16.mxu0 %vm259_vm0, %v2947_v18 }
 0x256   : > { %2746 = vmatmul.mubr.msk.bf16.gmra.mxu0 %vm259_vm0, %v2948_v19 }
 0x257   : > { %2749 = vmatprep.mubr.msk.bf16.mxu0 %vm259_vm0, %v2949_v21 }
 0x25e   : > { %2750 = vmatmul.mubr.msk.bf16.gmra.mxu0 %vm259_vm0, %v2950_v28 }
 0x25f   : > { %2807 = vmatprep.mubr.msk.bf16.mxu0 %vm3127_vm2, %v3126_v44 }
 0x2fe   : > { %v2735_v11 = vpop.f32.mrf.mxu0  ;;  %v3445_v35 = vpop.f32.mrf.mxu1 }
 0x300   : > { %v916_v12 = vpop.f32.mrf.mxu0  ;;  %v3447_v36 = vpop.f32.mrf.mxu1 }
 0x302   : > { %v2736_v14 = vpop.f32.mrf.mxu0  ;;  %v3449_v37 = vpop.f32.mrf.mxu1 }
 0x303   : > { %v3423_v15 = vpack.c.bf16 %v2736_v14, %v2735_v11  ;;  %v1022_v38 = vpack.c.bf16 %v3449_v37, %v3445_v35 }
 0x304   : > { %v919_v62 = vpop.f32.mrf.mxu0  ;;  %v3471_v51 = vpop.f32.mrf.mxu1 }
 0x305   : > { %v1011_v16 = vpack.c.bf16 %v919_v62, %v916_v12 }
 0x306   : > { %v2739_v17 = vpop.f32.mrf.mxu0 }
 0x307   : > { %2757 = vmatprep.subr.bf16.mxu1 %v1011_v16 }
 0x308   : > { %v932_v22 = vpop.f32.mrf.mxu0  ;;  %2758 = vmatpush3.bf16.msra.mxu1 %v1011_v16 }
 0x309   : > { %2767 = vmatprep.subr.bf16.mxu1 %v3126_v44 }
 0x30a   : > { %v2740_v23 = vpop.f32.mrf.mxu0 }
 0x30b   : > { %v3437_v24 = vpack.c.bf16 %v2740_v23, %v2739_v17 }
 0x30c   : > { %v935_v26 = vpop.f32.mrf.mxu0 }
 0x30d   : > { %v3439_v27 = vpack.c.bf16 %v935_v26, %v932_v22 }
 0x30e   : > { %v2743_v29 = vpop.f32.mrf.mxu0 }
 0x310   : > { %v948_v30 = vpop.f32.mrf.mxu0 }
 0x312   : > { %v2744_v31 = vpop.f32.mrf.mxu0 }
 0x313   : > { %v1016_v32 = vpack.c.bf16 %v2744_v31, %v2743_v29 }
 0x314   : > { %v951_v33 = vpop.f32.mrf.mxu0 }
 0x315   : > { %v1015_v34 = vpack.c.bf16 %v951_v33, %v948_v30  ;;  %1354 = vxpose.xlu0.c.b16.start.end [1/1] (short) (narrow) %v1016_v32, 64 }
 0x316   : > { %v2747_v43 = vpop.f32.mrf.mxu0 }
 0x317   : > { %1023 = vxpose.xlu1.c.b16.start.end [1/1] (short) (narrow) %v1015_v34, 64 }
 0x318   : > { %v964_v45 = vpop.f32.mrf.mxu0 }
 0x31a   : > { %v2748_v46 = vpop.f32.mrf.mxu0 }
 0x31b   : > { %v1018_v47 = vpack.c.bf16 %v2748_v46, %v2747_v43 }
 0x31c   : > { %v967_v48 = vpop.f32.mrf.mxu0 }
 0x31d   : > { %v1017_v5 = vpack.c.bf16 %v967_v48, %v964_v45 }
 0x31e   : > { %v3459_v49 = vpop.f32.mrf.mxu0 }
 0x320   : > { %v3461_v0 = vpop.f32.mrf.mxu0 }
 0x322   : > { %1685 = vxpose.xlu0.c.b16.start.end [1/1] (short) (narrow) %v1017_v5, 64  ;;  %v3463_v50 = vpop.f32.mrf.mxu0 }
 0x323   : > { %v1020_v1 = vpack.c.bf16 %v3463_v50, %v3459_v49  ;;  %v2956_v49 = vld [vmem:[%s3852_s5 + $0x28] sm:$0xff]   ;;  %v2957_v50 = vld [vmem:[%s3852_s5 + $0x30] sm:$0xff]  }
 0x324   : > { %2016 = vxpose.xlu1.c.b16.start.end [1/1] (short) (narrow) %v1018_v47, 64 }
 0x379   : > { %v1031_v39 = vpop.trf.xlu1 }
 0x37a   : > { %2759 = vmatprep.mubr.msk.bf16.mxu1 %vm1039_vm1, %v1031_v39 }
 0x37d   : > { %v1032_v40 = vpop.trf.xlu1 }
 0x37e   : > { %2760 = vmatmul.mubr.msk.bf16.vlgmr.msra.gmra.mxu1 %vm1039_vm1, %v1032_v40 }
 0x381   : > { %v1033_v41 = vpop.trf.xlu1 }
 0x382   : > { %2763 = vmatprep.mubr.msk.bf16.mxu1 %vm1039_vm1, %v1033_v41 }
 0x385   : > { %v1034_v42 = vpop.trf.xlu1 }
 0x386   : > { %2764 = vmatmul.mubr.msk.bf16.gmra.mxu1 %vm1039_vm1, %v1034_v42 }
 0x387   : > { %2775 = vmatprep.mubr.msk.bf16.mxu1 %vm3127_vm2, %v3126_v44 }
 0x43e   : > { %v2761_v2 = vpop.f32.mrf.mxu1 }
 0x43f   : > { %v1119_v3 = vsel %vm259_vm0, %v2761_v2, -inf }
 0x440   : > { %v1086_v52 = vpop.f32.mrf.mxu1 }
 0x441   : > { %v1117_v4 = vsel %vm259_vm0, %v1086_v52, -inf }
 0x442   : > { %v2762_v53 = vpop.f32.mrf.mxu1 }
 0x443   : > { %v1120_v56 = vsel %vm259_vm0, %v2762_v53, -inf }
 0x444   : > { %v1089_v54 = vpop.f32.mrf.mxu1 }
 0x445   : > { %v1118_v6 = vsel %vm259_vm0, %v1089_v54, -inf }
 0x446   : > { %v2765_v55 = vpop.f32.mrf.mxu1 }
 0x447   : > { %v1125_v57 = vsel %vm259_vm0, %v2765_v55, -inf }
 0x448   : > { %v1102_v13 = vpop.f32.mrf.mxu1  ;;  %v1126_v25 = vmax.f32 %v1119_v3, %v1125_v57 }
 0x449   : > { %v1121_v58 = vsel %vm259_vm0, %v1102_v13, -inf }
 0x44a   : > { %v2766_v10 = vpop.f32.mrf.mxu1  ;;  %v1122_v7 = vmax.f32 %v1117_v4, %v1121_v58 }
 0x44b   : > { %v1127_v59 = vsel %vm259_vm0, %v2766_v10, -inf }
 0x44c   : > { %v1128_v60 = vmax.f32 %v1120_v56, %v1127_v59  ;;  %v1105_v63 = vpop.f32.mrf.mxu1 }
 0x44d   : > { %v1123_v20 = vsel %vm259_vm0, %v1105_v63, -inf }
 0x44e   : > { %v1124_v8 = vmax.f32 %v1118_v6, %v1123_v20  ;;  %v1130_v61 = vmax.f32 %v1126_v25, %v1128_v60 }
 0x450   : > { %v1129_v9 = vmax.f32 %v1122_v7, %v1124_v8 }
 0x452   : > { %v1131_v11 = vmax.f32 %v1129_v9, %v1130_v61 }
 0x454   : > { %v1132_v12 = vrot.slane %v1131_v11, 4 }
 0x456   : > { %v1133_v14 = vmax.f32 %v1131_v11, %v1132_v12 }
 0x458   : > { %v1134_v62 = vrot.slane %v1133_v14, 2 }
 0x45a   : > { %v1135_v16 = vmax.f32 %v1133_v14, %v1134_v62 }
 0x45c   : > { %v1136_v17 = vrot.slane %v1135_v16, 1 }
 0x45e   : > { %v1137_v18 = vmax.f32 %v1135_v16, %v1136_v17 }
 0x460   : > { %v1138_v19 = vsub.f32 %v1086_v52, %v1137_v18  ;;  %v1139_v21 = vsub.f32 %v1089_v54, %v1137_v18  ;;  %v1140_v22 = vsub.f32 %v2761_v2, %v1137_v18  ;;  %v1141_v23 = vsub.f32 %v2762_v53, %v1137_v18 }
 0x461   : > { %v1142_v26 = vsub.f32 %v1102_v13, %v1137_v18  ;;  %v1143_v31 = vsub.f32 %v1105_v63, %v1137_v18  ;;  %v1144_v33 = vsub.f32 %v2765_v55, %v1137_v18  ;;  %v1145_v39 = vsub.f32 %v2766_v10, %v1137_v18 }
 0x462   : > { %v1146_v28 = vmul.f32 1.442695, %v1138_v19  ;;  %v1148_v29 = vmul.f32 1.442695, %v1139_v21  ;;  %v1150_v30 = vmul.f32 1.442695, %v1140_v22 }
 0x463   : > { %v1152_v32 = vmul.f32 1.442695, %v1141_v23  ;;  %v1154_v34 = vmul.f32 1.442695, %v1142_v26  ;;  %v1156_v40 = vmul.f32 1.442695, %v1143_v31 }
 0x464   : > { %2983 = vpow2.f32 %v1146_v28  ;;  %v1158_v41 = vmul.f32 1.442695, %v1144_v33  ;;  %v1160_v42 = vmul.f32 1.442695, %v1145_v39 }
 0x465   : > { %2985 = vpow2.f32 %v1148_v29 }
 0x466   : > { %2987 = vpow2.f32 %v1150_v30  ;;  %v983_v30 = vpop.f32.mrf.mxu0 }
 0x467   : > { %2989 = vpow2.f32 %v1152_v32  ;;  %v1019_v31 = vpack.c.bf16 %v983_v30, %v3461_v0  ;;  %v2951_v32 = vld [vmem:[%s3852_s5] sm:$0xff]   ;;  %v2953_v0 = vld [vmem:[%s3852_s5 + $0x10] sm:$0xff]  }
 0x468   : > { %2991 = vpow2.f32 %v1154_v34 }
 0x469   : > { %2993 = vpow2.f32 %v1156_v40 }
 0x46a   : > { %2995 = vpow2.f32 %v1158_v41 }
 0x46b   : > { %2997 = vpow2.f32 %v1160_v42  ;;  %v2952_v42 = vld [vmem:[%s3852_s5 + $0x8] sm:$0xff]  }
 0x471   : > { %v2984_v43 = vpop.eup %2983 }
 0x472   : > { %v2986_v45 = vpop.eup %2985  ;;  %v1162_v46 = vsel %vm259_vm0, %v2984_v43, 0.0 }
 0x473   : > { %v2988_v47 = vpop.eup %2987  ;;  %v1163_v48 = vsel %vm259_vm0, %v2986_v45, 0.0 }
 0x474   : > { %v2990_v5 = vpop.eup %2989  ;;  %v1164_v2 = vadd.f32 %v1163_v48, %v1162_v46  ;;  %v1165_v52 = vsel %vm259_vm0, %v2988_v47, 0.0  ;;  %v2954_v46 = vld [vmem:[%s3852_s5 + $0x18] sm:$0xff]  }
 0x475   : > { %v2992_v53 = vpop.eup %2991  ;;  %v1167_v55 = vsel %vm259_vm0, %v2990_v5, 0.0 }
 0x476   : > { %v1166_v54 = vadd.f32 %v1165_v52, %v1164_v2  ;;  %v2994_v13 = vpop.eup %2993  ;;  %v1169_v56 = vsel %vm259_vm0, %v2992_v53, 0.0 }
 0x477   : > { %v2996_v57 = vpop.eup %2995  ;;  %v1171_v59 = vsel %vm259_vm0, %v2994_v13, 0.0 }
 0x478   : > { %v1168_v10 = vadd.f32 %v1167_v55, %v1166_v54  ;;  %v2998_v60 = vpop.eup %2997  ;;  %v1173_v3 = vsel %vm259_vm0, %v2996_v57, 0.0 }
 0x479   : > { %v1175_v6 = vsel %vm259_vm0, %v2998_v60, 0.0 }
 0x47a   : > { %v1170_v58 = vadd.f32 %v1169_v56, %v1168_v10 }
 0x47c   : > { %v1172_v63 = vadd.f32 %v1171_v59, %v1170_v58 }
 0x47e   : > { %v1174_v4 = vadd.f32 %v1173_v3, %v1172_v63 }
 0x480   : > { %v1176_v20 = vadd.f32 %v1175_v6, %v1174_v4 }
 0x482   : > { %v1177_v25 = vrot.slane %v1176_v20, 4 }
 0x484   : > { %v1178_v7 = vadd.f32 %v1177_v25, %v1176_v20 }
 0x486   : > { %v1179_v8 = vrot.slane %v1178_v7, 2 }
 0x488   : > { %v1180_v61 = vadd.f32 %v1179_v8, %v1178_v7 }
 0x48a   : > { %v1181_v9 = vrot.slane %v1180_v61, 1 }
 0x48c   : > { %v1182_v11 = vadd.f32 %v1181_v9, %v1180_v61 }
 0x48e   : > { %2999 = vrcp.f32 %v1182_v11 }
 0x49b   : > { %v3000_v12 = vpop.eup %2999 }
 0x49c   : > { %v1190_v14 = vmul.f32 %v3000_v12, %v2996_v57  ;;  %v1191_v62 = vmul.f32 %v3000_v12, %v2998_v60  ;;  %v1184_v16 = vmul.f32 %v3000_v12, %v2984_v43  ;;  %v1185_v17 = vmul.f32 %v3000_v12, %v2986_v45  ;;  %v1362_v43 = vpop.trf.xlu0 }
 0x49d   : > { %v1188_v19 = vmul.f32 %v3000_v12, %v2992_v53  ;;  %v1189_v21 = vmul.f32 %v3000_v12, %v2994_v13  ;;  %v1186_v26 = vmul.f32 %v3000_v12, %v2988_v47  ;;  %v1187_v28 = vmul.f32 %v3000_v12, %v2990_v5 }
 0x49e   : > { %v1195_v18 = vpack.c.bf16 %v1191_v62, %v1190_v14  ;;  %v1192_v22 = vpack.c.bf16 %v1185_v17, %v1184_v16 }
 0x49f   : > { %v1194_v23 = vpack.c.bf16 %v1189_v21, %v1188_v19  ;;  %v1193_v29 = vpack.c.bf16 %v1187_v28, %v1186_v26 }
 0x4a0   : > { %2768 = vmatpush3.bf16.msra.mxu1 %v1195_v18  ;;  %v1363_v45 = vpop.trf.xlu0 }
 0x4a1   : > { %2769 = vmatprep.subr.bf16.mxu1 %v3126_v44 }
 0x4a4   : > { %2770 = vmatpush3.bf16.msra.mxu1 %v1194_v23  ;;  %v1364_v47 = vpop.trf.xlu0 }
 0x4a5   : > { %2771 = vmatprep.subr.bf16.mxu1 %v3126_v44 }
 0x4a8   : > { %2772 = vmatpush3.bf16.msra.mxu1 %v1193_v29  ;;  %v1365_v48 = vpop.trf.xlu0 }
 0x4a9   : > { %2773 = vmatprep.subr.bf16.mxu1 %v3126_v44 }
 0x4ac   : > { %2774 = vmatpush3.bf16.msra.mxu1 %v1192_v22 }
 0x4af   : > { %2776 = vmatmul.mubr.msk.bf16.vlgmr.msra.gmra.mxu1 %vm259_vm0, %v1019_v31 }
 0x4b0   : > { %2781 = vmatprep.mubr.msk.bf16.mxu1 %vm1039_vm1, %v2951_v32 }
 0x56f   : > { %v1233_v33 = vpop.f32.mrf.mxu1 }
 0x571   : > { %v2777_v34 = vpop.f32.mrf.mxu1 }
 0x573   : > { %v1236_v39 = vpop.f32.mrf.mxu1 }
 0x574   : > { %v1248_v40 = vpack.c.bf16 %v1236_v39, %v1233_v33 }
 0x575   : > { %v2778_v41 = vpop.f32.mrf.mxu1 }
 0x576   : > { %2779 = vmatprep.subr.bf16.mxu1 %v1248_v40 }
 0x577   : > { %2780 = vmatpush3.bf16.msra.mxu1 %v1248_v40 }
 0x578   : > { %2789 = vmatprep.subr.bf16.mxu1 %v3423_v15 }
 0x57a   : > { %2782 = vmatmul.mubr.msk.bf16.vlgmr.msra.gmra.mxu1 %vm1039_vm1, %v2952_v42 }
 0x57b   : > { %2790 = vmatpush3.bf16.msra.mxu1 %v3423_v15  ;;  %2785 = vmatprep.mubr.msk.bf16.mxu1 %vm1039_vm1, %v2953_v0  ;;  %v1693_v15 = vpop.trf.xlu0 }
 0x57c   : > { %2821 = vmatprep.subr.bf16.mxu1 %v3439_v27 }
 0x57f   : > { %v1694_v5 = vpop.trf.xlu0 }
 0x582   : > { %2786 = vmatmul.mubr.msk.bf16.gmra.mxu1 %vm1039_vm1, %v2954_v46 }
 0x583   : > { %2791 = vmatprep.mubr.msk.bf16.mxu1 %vm1039_vm1, %v1362_v43  ;;  %v1695_v2 = vpop.trf.xlu0 }
 0x587   : > { %v1696_v52 = vpop.trf.xlu0 }
 0x58a   : > { %2792 = vmatmul.mubr.msk.bf16.vlgmr.msra.gmra.mxu1 %vm1039_vm1, %v1363_v45 }
 0x58b   : > { %2822 = vmatpush3.bf16.msra.mxu1 %v3439_v27  ;;  %2795 = vmatprep.mubr.msk.bf16.mxu1 %vm1039_vm1, %v1364_v47 }
 0x592   : > { %2796 = vmatmul.mubr.msk.bf16.gmra.mxu1 %vm1039_vm1, %v1365_v48 }
 0x593   : > { %2823 = vmatprep.mubr.msk.bf16.mxu1 %vm1039_vm1, %v1693_v15 }
 0x59a   : > { %2824 = vmatmul.mubr.msk.bf16.vlgmr.msra.gmra.mxu1 %vm1039_vm1, %v1694_v5 }
 0x59b   : > { %2827 = vmatprep.mubr.msk.bf16.mxu1 %vm1039_vm1, %v1695_v2 }
 0x5a2   : > { %2828 = vmatmul.mubr.msk.bf16.gmra.mxu1 %vm1039_vm1, %v1696_v52 }
 0x63a   : > { %v3522_v53 = vpop.f32.mrf.mxu1 }
 0x63c   : > { %v3524_v54 = vpop.f32.mrf.mxu1 }
 0x63e   : > { %v3526_v27 = vpop.f32.mrf.mxu1 }
 0x640   : > { %v3528_v55 = vpop.f32.mrf.mxu1 }
 0x642   : > { %v3530_v13 = vpop.f32.mrf.mxu1 }
 0x644   : > { %v3532_v10 = vpop.f32.mrf.mxu1 }
 0x646   : > { %v3534_v56 = vpop.f32.mrf.mxu1 }
 0x648   : > { %v3536_v57 = vpop.f32.mrf.mxu1 }
 0x64a   : > { %v2793_v58 = vpop.f32.mrf.mxu1 }
 0x64b   : > { %v1449_v11 = vsel %vm259_vm0, %v2793_v58, -inf }
 0x64c   : > { %v1416_v59 = vpop.f32.mrf.mxu1 }
 0x64d   : > { %v1447_v12 = vsel %vm259_vm0, %v1416_v59, -inf }
 0x64e   : > { %v2794_v60 = vpop.f32.mrf.mxu1 }
 0x64f   : > { %v1450_v20 = vsel %vm259_vm0, %v2794_v60, -inf }
 0x650   : > { %v1419_v63 = vpop.f32.mrf.mxu1 }
 0x651   : > { %v1448_v14 = vsel %vm259_vm0, %v1419_v63, -inf }
 0x652   : > { %v3538_v3 = vpop.f32.mrf.mxu1 }
 0x653   : > { %v1455_v25 = vsel %vm259_vm0, %v3538_v3, -inf }
 0x654   : > { %v1432_v4 = vpop.f32.mrf.mxu1  ;;  %v1456_v16 = vmax.f32 %v1449_v11, %v1455_v25 }
 0x655   : > { %v1451_v7 = vsel %vm259_vm0, %v1432_v4, -inf }
 0x656   : > { %v3540_v6 = vpop.f32.mrf.mxu1  ;;  %v1452_v17 = vmax.f32 %v1447_v12, %v1451_v7 }
 0x657   : > { %v1457_v8 = vsel %vm259_vm0, %v3540_v6, -inf }
 0x658   : > { %v1458_v61 = vmax.f32 %v1450_v20, %v1457_v8  ;;  %v1435_v9 = vpop.f32.mrf.mxu1 }
 0x659   : > { %v1453_v62 = vsel %vm259_vm0, %v1435_v9, -inf }
 0x65a   : > { %v1454_v18 = vmax.f32 %v1448_v14, %v1453_v62  ;;  %v3552_v19 = vpop.f32.mrf.mxu1  ;;  %v1460_v21 = vmax.f32 %v1456_v16, %v1458_v61 }
 0x65b   : > { %v1780_v34 = vsel %vm259_vm0, %v3552_v19, -inf }
 0x65c   : > { %v1459_v22 = vmax.f32 %v1452_v17, %v1454_v18  ;;  %v3554_v23 = vpop.f32.mrf.mxu1 }
 0x65d   : > { %v1778_v0 = vsel %vm259_vm0, %v3554_v23, -inf }
 0x65e   : > { %v1461_v26 = vmax.f32 %v1459_v22, %v1460_v21  ;;  %v3556_v28 = vpop.f32.mrf.mxu1 }
 0x65f   : > { %v1781_v41 = vsel %vm259_vm0, %v3556_v28, -inf }
 0x660   : > { %v1462_v29 = vrot.slane %v1461_v26, 4  ;;  %v3558_v30 = vpop.f32.mrf.mxu1 }
 0x661   : > { %v1779_v45 = vsel %vm259_vm0, %v3558_v30, -inf }
 0x662   : > { %v1463_v31 = vmax.f32 %v1461_v26, %v1462_v29  ;;  %v3560_v32 = vpop.f32.mrf.mxu1 }
 0x663   : > { %v1786_v39 = vsel %vm259_vm0, %v3560_v32, -inf }
 0x664   : > { %v1464_v33 = vrot.slane %v1463_v31, 2  ;;  %v3566_v40 = vpop.f32.mrf.mxu1  ;;  %v1787_v46 = vmax.f32 %v1780_v34, %v1786_v39 }
 0x665   : > { %v1782_v47 = vsel %vm259_vm0, %v3566_v40, -inf }
 0x666   : > { %v1465_v42 = vmax.f32 %v1463_v31, %v1464_v33  ;;  %v3572_v43 = vpop.f32.mrf.mxu1  ;;  %v1783_v25 = vmax.f32 %v1778_v0, %v1782_v47 }
 0x667   : > { %v1788_v48 = vsel %vm259_vm0, %v3572_v43, -inf }
 0x668   : > { %v1466_v15 = vrot.slane %v1465_v42, 1  ;;  %v1789_v5 = vmax.f32 %v1781_v41, %v1788_v48  ;;  %v3580_v2 = vpop.f32.mrf.mxu1 }
 0x669   : > { %v1784_v52 = vsel %vm259_vm0, %v3580_v2, -inf }
 0x66a   : > { %v1467_v20 = vmax.f32 %v1465_v42, %v1466_v15  ;;  %v1785_v7 = vmax.f32 %v1779_v45, %v1784_v52  ;;  %v1791_v8 = vmax.f32 %v1787_v46, %v1789_v5 }
 0x66c   : > { %v1468_v61 = vsub.f32 %v1416_v59, %v1467_v20  ;;  %v1469_v11 = vsub.f32 %v1419_v63, %v1467_v20  ;;  %v1470_v12 = vsub.f32 %v2793_v58, %v1467_v20  ;;  %v1471_v14 = vsub.f32 %v2794_v60, %v1467_v20 }
 0x66d   : > { %v1472_v62 = vsub.f32 %v1432_v4, %v1467_v20  ;;  %v1790_v21 = vmax.f32 %v1783_v25, %v1785_v7  ;;  %v1473_v22 = vsub.f32 %v1435_v9, %v1467_v20  ;;  %v1474_v31 = vsub.f32 %v3538_v3, %v1467_v20 }
 0x66e   : > { %v1476_v16 = vmul.f32 1.442695, %v1468_v61  ;;  %v1478_v17 = vmul.f32 1.442695, %v1469_v11  ;;  %v1480_v18 = vmul.f32 1.442695, %v1470_v12  ;;  %v1475_v59 = vsub.f32 %v3540_v6, %v1467_v20 }
 0x66f   : > { %v1482_v26 = vmul.f32 1.442695, %v1471_v14  ;;  %v1792_v29 = vmax.f32 %v1790_v21, %v1791_v8  ;;  %v1484_v33 = vmul.f32 1.442695, %v1472_v62  ;;  %v1486_v58 = vmul.f32 1.442695, %v1473_v22 }
 0x670   : > { %3001 = vpow2.f32 %v1476_v16  ;;  %v1488_v63 = vmul.f32 1.442695, %v1474_v31  ;;  %v1490_v39 = vmul.f32 1.442695, %v1475_v59 }
 0x671   : > { %3003 = vpow2.f32 %v1478_v17  ;;  %v1793_v34 = vrot.slane %v1792_v29, 4 }
 0x672   : > { %3005 = vpow2.f32 %v1480_v18 }
 0x673   : > { %3007 = vpow2.f32 %v1482_v26  ;;  %v1794_v60 = vmax.f32 %v1792_v29, %v1793_v34 }
 0x674   : > { %3009 = vpow2.f32 %v1484_v33 }
 0x675   : > { %v1795_v4 = vrot.slane %v1794_v60, 2  ;;  %3011 = vpow2.f32 %v1486_v58 }
 0x676   : > { %3013 = vpow2.f32 %v1488_v63 }
 0x677   : > { %v1796_v9 = vmax.f32 %v1794_v60, %v1795_v4  ;;  %3015 = vpow2.f32 %v1490_v39 }
 0x679   : > { %v1797_v41 = vrot.slane %v1796_v9, 1 }
 0x67b   : > { %v1798_v42 = vmax.f32 %v1796_v9, %v1797_v41 }
 0x67d   : > { %v3586_v3 = vpop.eup %3001  ;;  %v1799_v45 = vsub.f32 %v3554_v23, %v1798_v42  ;;  %v1800_v46 = vsub.f32 %v3558_v30, %v1798_v42  ;;  %v1801_v47 = vsub.f32 %v3552_v19, %v1798_v42  ;;  %v1802_v5 = vsub.f32 %v3556_v28, %v1798_v42 }
 0x67e   : > { %v3588_v0 = vpop.eup %3003  ;;  %v1492_v6 = vsel %vm259_vm0, %v3586_v3, 0.0  ;;  %v1803_v52 = vsub.f32 %v3566_v40, %v1798_v42  ;;  %v1804_v7 = vsub.f32 %v3580_v2, %v1798_v42  ;;  %v1805_v11 = vsub.f32 %v3560_v32, %v1798_v42 }
 0x67f   : > { %v3595_v48 = vpop.eup %3005  ;;  %v1493_v15 = vsel %vm259_vm0, %v3588_v0, 0.0  ;;  %v1807_v30 = vmul.f32 1.442695, %v1799_v45  ;;  %v1809_v8 = vmul.f32 1.442695, %v1800_v46  ;;  %v1806_v16 = vsub.f32 %v3572_v43, %v1798_v42 }
 0x680   : > { %v3601_v20 = vpop.eup %3007  ;;  %v1494_v25 = vadd.f32 %v1493_v15, %v1492_v6  ;;  %v1495_v23 = vsel %vm259_vm0, %v3595_v48, 0.0  ;;  %v1811_v12 = vmul.f32 1.442695, %v1801_v47  ;;  %v1813_v14 = vmul.f32 1.442695, %v1802_v5 }
 0x681   : > { %v3606_v19 = vpop.eup %3009  ;;  %v1497_v28 = vsel %vm259_vm0, %v3601_v20, 0.0  ;;  %3017 = vpow2.f32 %v1807_v30  ;;  %v1815_v40 = vmul.f32 1.442695, %v1803_v52  ;;  %v1817_v17 = vmul.f32 1.442695, %v1804_v7 }
 0x682   : > { %v1496_v61 = vadd.f32 %v1495_v23, %v1494_v25  ;;  %v3611_v62 = vpop.eup %3011  ;;  %3019 = vpow2.f32 %v1809_v8  ;;  %v1499_v18 = vsel %vm259_vm0, %v3606_v19, 0.0  ;;  %v1819_v22 = vmul.f32 1.442695, %v1805_v11 }
 0x683   : > { %3021 = vpow2.f32 %v1811_v12  ;;  %v3014_v21 = vpop.eup %3013  ;;  %v1501_v26 = vsel %vm259_vm0, %v3611_v62, 0.0  ;;  %v1821_v33 = vmul.f32 1.442695, %v1806_v16 }
 0x684   : > { %v1498_v2 = vadd.f32 %v1497_v28, %v1496_v61  ;;  %3023 = vpow2.f32 %v1813_v14  ;;  %v3016_v29 = vpop.eup %3015  ;;  %v1503_v43 = vsel %vm259_vm0, %v3014_v21, 0.0 }
 0x685   : > { %3025 = vpow2.f32 %v1815_v40  ;;  %v1505_v59 = vsel %vm259_vm0, %v3016_v29, 0.0 }
 0x686   : > { %v1500_v32 = vadd.f32 %v1499_v18, %v1498_v2  ;;  %3027 = vpow2.f32 %v1817_v17 }
 0x687   : > { %3029 = vpow2.f32 %v1819_v22 }
 0x688   : > { %v1502_v31 = vadd.f32 %v1501_v26, %v1500_v32  ;;  %3031 = vpow2.f32 %v1821_v33 }
 0x68a   : > { %v1504_v34 = vadd.f32 %v1503_v43, %v1502_v31 }
 0x68c   : > { %v1506_v58 = vadd.f32 %v1505_v59, %v1504_v34 }
 0x68e   : > { %v1507_v60 = vrot.slane %v1506_v58, 4  ;;  %v3018_v63 = vpop.eup %3017 }
 0x68f   : > { %v3020_v39 = vpop.eup %3019  ;;  %v1823_v9 = vsel %vm259_vm0, %v3018_v63, 0.0 }
 0x690   : > { %v1508_v4 = vadd.f32 %v1507_v60, %v1506_v58  ;;  %v3621_v41 = vpop.eup %3021  ;;  %v1824_v6 = vsel %vm259_vm0, %v3020_v39, 0.0 }
 0x691   : > { %v3624_v45 = vpop.eup %3023  ;;  %v1825_v46 = vadd.f32 %v1824_v6, %v1823_v9  ;;  %v1826_v47 = vsel %vm259_vm0, %v3621_v41, 0.0 }
 0x692   : > { %v1509_v42 = vrot.slane %v1508_v4, 2  ;;  %v3628_v15 = vpop.eup %3025  ;;  %v1828_v52 = vsel %vm259_vm0, %v3624_v45, 0.0 }
 0x693   : > { %v3632_v25 = vpop.eup %3027  ;;  %v1827_v7 = vadd.f32 %v1826_v47, %v1825_v46  ;;  %v1830_v30 = vsel %vm259_vm0, %v3628_v15, 0.0 }
 0x694   : > { %v1510_v5 = vadd.f32 %v1509_v42, %v1508_v4  ;;  %v3030_v8 = vpop.eup %3029  ;;  %v1832_v12 = vsel %vm259_vm0, %v3632_v25, 0.0 }
 0x695   : > { %v1829_v61 = vadd.f32 %v1828_v52, %v1827_v7  ;;  %v3032_v14 = vpop.eup %3031  ;;  %v1834_v40 = vsel %vm259_vm0, %v3030_v8, 0.0 }
 0x696   : > { %v1511_v23 = vrot.slane %v1510_v5, 1  ;;  %v1836_v16 = vsel %vm259_vm0, %v3032_v14, 0.0 }
 0x697   : > { %v1831_v28 = vadd.f32 %v1830_v30, %v1829_v61 }
 0x698   : > { %v1512_v11 = vadd.f32 %v1511_v23, %v1510_v5 }
 0x699   : > { %v1833_v2 = vadd.f32 %v1832_v12, %v1831_v28  ;;  %v2958_v28 = vld [vmem:[%s3852_s5 + $0x38] sm:$0xff]  }
 0x69a   : > { %3033 = vrcp.f32 %v1512_v11 }
 0x69b   : > { %v1835_v17 = vadd.f32 %v1834_v40, %v1833_v2 }
 0x69d   : > { %v1837_v18 = vadd.f32 %v1836_v16, %v1835_v17  ;;  %v3056_v17 = vld [vmem:[%s3219_s13] sm:$0xff] }
 0x69f   : > { %v1838_v32 = vrot.slane %v1837_v18, 4 }
 0x6a1   : > { %v1839_v22 = vadd.f32 %v1838_v32, %v1837_v18  ;;  %v1346_v18 = vadd.f32 %v3056_v17, %v3524_v54 }
 0x6a3   : > { %v1840_v26 = vrot.slane %v1839_v22, 2 }
 0x6a5   : > { %v1841_v33 = vadd.f32 %v1840_v26, %v1839_v22  ;;  %v3057_v26 = vld [vmem:[%s3219_s13 + $0x18] sm:$0xff] }
 0x6a7   : > { %v3034_v31 = vpop.eup %3033  ;;  %v1842_v42 = vrot.slane %v1841_v33, 1 }
 0x6a8   : > { %v1520_v43 = vmul.f32 %v3034_v31, %v3014_v21  ;;  %v1521_v34 = vmul.f32 %v3034_v31, %v3016_v29  ;;  %v1514_v59 = vmul.f32 %v3034_v31, %v3586_v3  ;;  %v1515_v58 = vmul.f32 %v3034_v31, %v3588_v0 }
 0x6a9   : > { %v1518_v4 = vmul.f32 %v3034_v31, %v3606_v19  ;;  %v1519_v9 = vmul.f32 %v3034_v31, %v3611_v62  ;;  %v1843_v46 = vadd.f32 %v1842_v42, %v1841_v33  ;;  %v1516_v5 = vmul.f32 %v3034_v31, %v3595_v48  ;;  %v3060_v42 = vld [vmem:[%s3219_s13 + $0x20] sm:$0xff] }
 0x6aa   : > { %v1525_v60 = vpack.c.bf16 %v1521_v34, %v1520_v43  ;;  %v1522_v6 = vpack.c.bf16 %v1515_v58, %v1514_v59  ;;  %v1517_v21 = vmul.f32 %v3034_v31, %v3601_v20  ;;  %v2955_v20 = vld [vmem:[%s3852_s5 + $0x20] sm:$0xff]   ;;  %v1349_v31 = vadd.f32 %v3057_v26, %v3526_v27  ;;  %v3058_v34 = vld [vmem:[%s3219_s13 + $0x8] sm:$0xff] }
 0x6ab   : > { %v1524_v47 = vpack.c.bf16 %v1519_v9, %v1518_v4  ;;  %3035 = vrcp.f32 %v1843_v46  ;;  %v1347_v59 = vadd.f32 %v3058_v34, %v3528_v55 }
 0x6ac   : > { %2800 = vmatpush3.bf16.msra.mxu0 %v1525_v60  ;;  %v1523_v3 = vpack.c.bf16 %v1517_v21, %v1516_v5  ;;  %v3059_v60 = vld [vmem:[%s3219_s13 + $0x30] sm:$0xff] }
 0x6ad   : > { %2801 = vmatprep.subr.bf16.mxu0 %v3126_v44  ;;  %v1352_v54 = vadd.f32 %v3059_v60, %v3530_v13 }
 0x6b0   : > { %2802 = vmatpush3.bf16.msra.mxu0 %v1524_v47  ;;  %v3061_v47 = vld [vmem:[%s3219_s13 + $0x38] sm:$0xff] }
 0x6b1   : > { %2803 = vmatprep.subr.bf16.mxu0 %v3126_v44  ;;  %v1353_v5 = vadd.f32 %v3061_v47, %v3534_v56  ;;  %v2960_v56 = vld [vmem:[%s3852_s5 + $0x48] sm:$0xff]  }
 0x6b4   : > { %2804 = vmatpush3.bf16.msra.mxu0 %v1523_v3  ;;  %v3062_v3 = vld [vmem:[%s3219_s13 + $0x28] sm:$0xff] }
 0x6b5   : > { %2805 = vmatprep.subr.bf16.mxu0 %v3126_v44 }
 0x6b8   : > { %2806 = vmatpush3.bf16.msra.mxu0 %v1522_v6  ;;  %v3036_v0 = vpop.eup %3035  ;;  %v1350_v6 = vadd.f32 %v3060_v42, %v3532_v10 }
 0x6b9   : > { %v1845_v19 = vmul.f32 %v3036_v0, %v3018_v63  ;;  %v1846_v62 = vmul.f32 %v3036_v0, %v3020_v39  ;;  %v1851_v61 = vmul.f32 %v3036_v0, %v3030_v8  ;;  %v1852_v11 = vmul.f32 %v3036_v0, %v3032_v14 }
 0x6ba   : > { %v1849_v63 = vmul.f32 %v3036_v0, %v3628_v15  ;;  %v1850_v39 = vmul.f32 %v3036_v0, %v3632_v25  ;;  %v1847_v12 = vmul.f32 %v3036_v0, %v3621_v41  ;;  %v1848_v14 = vmul.f32 %v3036_v0, %v3624_v45  ;;  %v2024_v41 = vpop.trf.xlu1 }
 0x6bb   : > { %2808 = vmatmul.mubr.msk.bf16.vlgmr.msra.gmra.mxu0 %vm259_vm0, %v1020_v1  ;;  %v1853_v48 = vpack.c.bf16 %v1846_v62, %v1845_v19  ;;  %v1856_v1 = vpack.c.bf16 %v1852_v11, %v1851_v61  ;;  %v1021_v45 = vpack.c.bf16 %v3471_v51, %v3447_v36  ;;  %v2959_v36 = vld [vmem:[%s3852_s5 + $0x40] sm:$0xff]   ;;  %v1351_v0 = vadd.f32 %v3062_v3, %v3536_v57  ;;  %v2961_v57 = vld [vmem:[%s3852_s5 + $0x50] sm:$0xff]   ;;  %v2962_v11 = vld [vmem:[%s3852_s5 + $0x58] sm:$0xff]  }
 0x6bc   : > { %2813 = vmatprep.mubr.msk.bf16.mxu0 %vm1039_vm1, %v2955_v20  ;;  %v1855_v8 = vpack.c.bf16 %v1850_v39, %v1849_v63  ;;  %v1854_v15 = vpack.c.bf16 %v1848_v14, %v1847_v12  ;;  %2845 = vmatprep.mubr.msk.bf16.mxu1 %vm1039_vm1, %v2959_v36 }
 0x6be   : > { %v2025_v25 = vpop.trf.xlu1 }
 0x6c2   : > { %v2026_v40 = vpop.trf.xlu1 }
 0x6c6   : > { %v2027_v2 = vpop.trf.xlu1 }
 0x77b   : > { %v1563_v29 = vpop.f32.mrf.mxu0 }
 0x77d   : > { %v2809_v52 = vpop.f32.mrf.mxu0 }
 0x77f   : > { %v1566_v7 = vpop.f32.mrf.mxu0 }
 0x780   : > { %v1579_v23 = vpack.c.bf16 %v1566_v7, %v1563_v29 }
 0x781   : > { %v2810_v30 = vpop.f32.mrf.mxu0 }
 0x782   : > { %2811 = vmatprep.subr.bf16.mxu0 %v1579_v23 }
 0x783   : > { %2812 = vmatpush3.bf16.msra.mxu0 %v1579_v23 }
 0x784   : > { %2831 = vmatprep.subr.bf16.mxu0 %v3126_v44 }
 0x786   : > { %2814 = vmatmul.mubr.msk.bf16.vlgmr.msra.gmra.mxu0 %vm1039_vm1, %v2956_v49 }
 0x787   : > { %2832 = vmatpush3.bf16.msra.mxu0 %v1856_v1  ;;  %2817 = vmatprep.mubr.msk.bf16.mxu0 %vm1039_vm1, %v2957_v50 }
 0x788   : > { %2833 = vmatprep.subr.bf16.mxu0 %v3126_v44 }
 0x78b   : > { %2834 = vmatpush3.bf16.msra.mxu0 %v1855_v8 }
 0x78c   : > { %2835 = vmatprep.subr.bf16.mxu0 %v3126_v44 }
 0x78e   : > { %2818 = vmatmul.mubr.msk.bf16.gmra.mxu0 %vm1039_vm1, %v2958_v28 }
 0x78f   : > { %2836 = vmatpush3.bf16.msra.mxu0 %v1854_v15  ;;  %2839 = vmatprep.mubr.msk.bf16.mxu0 %vm3127_vm2, %v3126_v44 }
 0x790   : > { %2837 = vmatprep.subr.bf16.mxu0 %v3126_v44 }
 0x793   : > { %2838 = vmatpush3.bf16.msra.mxu0 %v1853_v48 }
 0x794   : > { %2853 = vmatprep.subr.bf16.mxu0 %v3437_v24 }
 0x796   : > { %2840 = vmatmul.mubr.msk.bf16.vlgmr.msra.gmra.mxu0 %vm259_vm0, %v1021_v45 }
 0x797   : > { %2854 = vmatpush3.bf16.msra.mxu0 %v3437_v24  ;;  %2855 = vmatprep.mubr.msk.bf16.mxu0 %vm1039_vm1, %v2024_v41  ;;  %v3055_v24 = vld [vmem:[%s3219_s13 + $0x10] sm:$0xff]  ;;  %s2560_s13 = sshll.u32 %s3187_s25, 10  ;;  %s3807_s25 = scalar_lea.sflag [#allocation3], %s242_s19 }
 0x798   : > { %v1348_v51 = vadd.f32 %v3055_v24, %v3522_v53  ;;  %s3799_s10 = scalar_lea.hbm %s3853_s6, %s2560_s13 }
 0x79e   : > { %2856 = vmatmul.mubr.msk.bf16.vlgmr.msra.gmra.mxu0 %vm1039_vm1, %v2025_v25 }
 0x79f   : > { %2859 = vmatprep.mubr.msk.bf16.mxu0 %vm1039_vm1, %v2026_v40 }
 0x7a6   : > { %2860 = vmatmul.mubr.msk.bf16.gmra.mxu0 %vm1039_vm1, %v2027_v2 }
 0x846   : > { %v2815_v16 = vpop.f32.mrf.mxu0 }
 0x847   : > { %v3696_v32 = vadd.f32 %v2815_v16, %v1348_v51 }
 0x848   : > { %v1646_v22 = vpop.f32.mrf.mxu0 }
 0x849   : > { %v3700_v33 = vadd.f32 %v1646_v22, %v1346_v18 }
 0x84a   : > { %v2816_v43 = vpop.f32.mrf.mxu0 }
 0x84b   : > { %v3704_v53 = vadd.f32 %v2816_v43, %v1349_v31 }
 0x84c   : > { %v1649_v58 = vpop.f32.mrf.mxu0 }
 0x84d   : > { %v3708_v4 = vadd.f32 %v1649_v58, %v1347_v59 }
 0x84e   : > { %v2819_v9 = vpop.f32.mrf.mxu0 }
 0x84f   : > { %v3712_v27 = vadd.f32 %v2819_v9, %v1352_v54 }
 0x850   : > { %v1662_v46 = vpop.f32.mrf.mxu0 }
 0x851   : > { %v3716_v21 = vadd.f32 %v1662_v46, %v1350_v6 }
 0x852   : > { %v2820_v55 = vpop.f32.mrf.mxu0 }
 0x853   : > { %v3720_v19 = vadd.f32 %v2820_v55, %v1353_v5 }
 0x854   : > { %v1665_v13 = vpop.f32.mrf.mxu0 }
 0x855   : > { %v3722_v62 = vadd.f32 %v1665_v13, %v1351_v0 }
 0x856   : > { %v1894_v48 = vpop.f32.mrf.mxu0 }
 0x858   : > { %v2841_v20 = vpop.f32.mrf.mxu0 }
 0x85a   : > { %v1897_v10 = vpop.f32.mrf.mxu0 }
 0x85b   : > { %v1910_v29 = vpack.c.bf16 %v1897_v10, %v1894_v48 }
 0x85c   : > { %v2842_v52 = vpop.f32.mrf.mxu0 }
 0x85d   : > { %2843 = vmatprep.subr.bf16.mxu1 %v1910_v29 }
 0x85e   : > { %2844 = vmatpush3.bf16.msra.mxu1 %v1910_v29  ;;  %v2857_v7 = vpop.f32.mrf.mxu0 }
 0x85f   : > { %2863 = vmatprep.subr.bf16.mxu1 %v3126_v44  ;;  %v2111_v15 = vsel %vm259_vm0, %v2857_v7, -inf }
 0x860   : > { %v2078_v23 = vpop.f32.mrf.mxu0 }
 0x861   : > { %2846 = vmatmul.mubr.msk.bf16.vlgmr.msra.gmra.mxu1 %vm1039_vm1, %v2960_v56  ;;  %v2109_v41 = vsel %vm259_vm0, %v2078_v23, -inf }
 0x862   : > { %v2858_v30 = vpop.f32.mrf.mxu0  ;;  %2849 = vmatprep.mubr.msk.bf16.mxu1 %vm1039_vm1, %v2961_v57 }
 0x863   : > { %v2112_v63 = vsel %vm259_vm0, %v2858_v30, -inf }
 0x864   : > { %v2081_v61 = vpop.f32.mrf.mxu0 }
 0x865   : > { %v2110_v45 = vsel %vm259_vm0, %v2081_v61, -inf }
 0x866   : > { %v2861_v49 = vpop.f32.mrf.mxu0 }
 0x867   : > { %v2117_v39 = vsel %vm259_vm0, %v2861_v49, -inf }
 0x868   : > { %v2094_v50 = vpop.f32.mrf.mxu0  ;;  %v2118_v40 = vmax.f32 %v2111_v15, %v2117_v39 }
 0x869   : > { %2850 = vmatmul.mubr.msk.bf16.gmra.mxu1 %vm1039_vm1, %v2962_v11  ;;  %v2113_v8 = vsel %vm259_vm0, %v2094_v50, -inf }
 0x86a   : > { %v2862_v1 = vpop.f32.mrf.mxu0  ;;  %2871 = vmatprep.mubr.msk.bf16.mxu1 %vm3127_vm2, %v3126_v44  ;;  %v2114_v2 = vmax.f32 %v2109_v41, %v2113_v8 }
 0x86b   : > { %v2119_v12 = vsel %vm259_vm0, %v2862_v1, -inf }
 0x86c   : > { %v2120_v14 = vmax.f32 %v2112_v63, %v2119_v12  ;;  %v2097_v28 = vpop.f32.mrf.mxu0 }
 0x86d   : > { %v2115_v25 = vsel %vm259_vm0, %v2097_v28, -inf }
 0x86e   : > { %v2116_v36 = vmax.f32 %v2110_v45, %v2115_v25  ;;  %v2122_v24 = vmax.f32 %v2118_v40, %v2120_v14 }
 0x870   : > { %v2121_v51 = vmax.f32 %v2114_v2, %v2116_v36 }
 0x872   : > { %v2123_v16 = vmax.f32 %v2121_v51, %v2122_v24 }
 0x874   : > { %v2124_v17 = vrot.slane %v2123_v16, 4 }
 0x876   : > { %v2125_v18 = vmax.f32 %v2123_v16, %v2124_v17 }
 0x878   : > { %v2126_v22 = vrot.slane %v2125_v18, 2 }
 0x87a   : > { %v2127_v26 = vmax.f32 %v2125_v18, %v2126_v22 }
 0x87c   : > { %v2128_v31 = vrot.slane %v2127_v26, 1 }
 0x87e   : > { %v2129_v43 = vmax.f32 %v2127_v26, %v2128_v31 }
 0x880   : > { %v2130_v34 = vsub.f32 %v2078_v23, %v2129_v43  ;;  %v2131_v59 = vsub.f32 %v2081_v61, %v2129_v43  ;;  %v2132_v58 = vsub.f32 %v2857_v7, %v2129_v43  ;;  %v2133_v60 = vsub.f32 %v2858_v30, %v2129_v43 }
 0x881   : > { %v2134_v54 = vsub.f32 %v2094_v50, %v2129_v43  ;;  %v2135_v46 = vsub.f32 %v2097_v28, %v2129_v43  ;;  %v2136_v5 = vsub.f32 %v2861_v49, %v2129_v43  ;;  %v2137_v3 = vsub.f32 %v2862_v1, %v2129_v43 }
 0x882   : > { %v2138_v9 = vmul.f32 1.442695, %v2130_v34  ;;  %v2140_v42 = vmul.f32 1.442695, %v2131_v59  ;;  %v2142_v6 = vmul.f32 1.442695, %v2132_v58 }
 0x883   : > { %v2144_v47 = vmul.f32 1.442695, %v2133_v60  ;;  %v2146_v55 = vmul.f32 1.442695, %v2134_v54  ;;  %v2148_v0 = vmul.f32 1.442695, %v2135_v46 }
 0x884   : > { %3037 = vpow2.f32 %v2138_v9  ;;  %v2150_v13 = vmul.f32 1.442695, %v2136_v5  ;;  %v2152_v48 = vmul.f32 1.442695, %v2137_v3 }
 0x885   : > { %3039 = vpow2.f32 %v2140_v42  ;;  %v2963_v42 = vld [vmem:[%s3852_s5 + $0x60] sm:$0xff]  }
 0x886   : > { %3041 = vpow2.f32 %v2142_v6  ;;  %2877 = vmatprep.mubr.msk.bf16.mxu0 %vm1039_vm1, %v2963_v42 }
 0x887   : > { %3043 = vpow2.f32 %v2144_v47 }
 0x888   : > { %3045 = vpow2.f32 %v2146_v55 }
 0x889   : > { %3047 = vpow2.f32 %v2148_v0 }
 0x88a   : > { %3049 = vpow2.f32 %v2150_v13 }
 0x88b   : > { %3051 = vpow2.f32 %v2152_v48 }
 0x891   : > { %v3038_v20 = vpop.eup %3037 }
 0x892   : > { %v3040_v10 = vpop.eup %3039  ;;  %v2154_v29 = vsel %vm259_vm0, %v3038_v20, 0.0 }
 0x893   : > { %v3042_v52 = vpop.eup %3041  ;;  %v2155_v56 = vsel %vm259_vm0, %v3040_v10, 0.0 }
 0x894   : > { %v3044_v7 = vpop.eup %3043  ;;  %v2156_v57 = vadd.f32 %v2155_v56, %v2154_v29  ;;  %v2157_v23 = vsel %vm259_vm0, %v3042_v52, 0.0 }
 0x895   : > { %v3046_v30 = vpop.eup %3045  ;;  %v2159_v11 = vsel %vm259_vm0, %v3044_v7, 0.0 }
 0x896   : > { %v2158_v61 = vadd.f32 %v2157_v23, %v2156_v57  ;;  %v3048_v49 = vpop.eup %3047  ;;  %v2161_v1 = vsel %vm259_vm0, %v3046_v30, 0.0 }
 0x897   : > { %v3050_v63 = vpop.eup %3049  ;;  %v2163_v8 = vsel %vm259_vm0, %v3048_v49, 0.0 }
 0x898   : > { %v2160_v50 = vadd.f32 %v2159_v11, %v2158_v61  ;;  %v3052_v12 = vpop.eup %3051  ;;  %v2165_v28 = vsel %vm259_vm0, %v3050_v63, 0.0 }
 0x899   : > { %v2167_v41 = vsel %vm259_vm0, %v3052_v12, 0.0 }
 0x89a   : > { %v2162_v39 = vadd.f32 %v2161_v1, %v2160_v50 }
 0x89c   : > { %v2164_v14 = vadd.f32 %v2163_v8, %v2162_v39 }
 0x89e   : > { %v2166_v15 = vadd.f32 %v2165_v28, %v2164_v14 }
 0x8a0   : > { %v2168_v45 = vadd.f32 %v2167_v41, %v2166_v15 }
 0x8a2   : > { %v2169_v25 = vrot.slane %v2168_v45, 4 }
 0x8a4   : > { %v2170_v40 = vadd.f32 %v2169_v25, %v2168_v45 }
 0x8a6   : > { %v2171_v2 = vrot.slane %v2170_v40, 2 }
 0x8a8   : > { %v2172_v36 = vadd.f32 %v2171_v2, %v2170_v40 }
 0x8aa   : > { %v2173_v24 = vrot.slane %v2172_v36, 1 }
 0x8ac   : > { %v2174_v51 = vadd.f32 %v2173_v24, %v2172_v36 }
 0x8ae   : > { %3053 = vrcp.f32 %v2174_v51 }
 0x8bb   : > { %v3054_v16 = vpop.eup %3053 }
 0x8bc   : > { %v2182_v17 = vmul.f32 %v3054_v16, %v3050_v63  ;;  %v2183_v18 = vmul.f32 %v3054_v16, %v3052_v12  ;;  %v2176_v22 = vmul.f32 %v3054_v16, %v3038_v20  ;;  %v2177_v26 = vmul.f32 %v3054_v16, %v3040_v10 }
 0x8bd   : > { %v2180_v43 = vmul.f32 %v3054_v16, %v3046_v30  ;;  %v2181_v34 = vmul.f32 %v3054_v16, %v3048_v49  ;;  %v2178_v60 = vmul.f32 %v3054_v16, %v3042_v52  ;;  %v2179_v54 = vmul.f32 %v3054_v16, %v3044_v7 }
 0x8be   : > { %v2187_v31 = vpack.c.bf16 %v2183_v18, %v2182_v17  ;;  %v2184_v59 = vpack.c.bf16 %v2177_v26, %v2176_v22 }
 0x8bf   : > { %v2186_v58 = vpack.c.bf16 %v2181_v34, %v2180_v43  ;;  %v2185_v9 = vpack.c.bf16 %v2179_v54, %v2178_v60 }
 0x8c0   : > { %2864 = vmatpush3.bf16.msra.mxu1 %v2187_v31 }
 0x8c1   : > { %2865 = vmatprep.subr.bf16.mxu1 %v3126_v44 }
 0x8c4   : > { %2866 = vmatpush3.bf16.msra.mxu1 %v2186_v58 }
 0x8c5   : > { %2867 = vmatprep.subr.bf16.mxu1 %v3126_v44 }
 0x8c8   : > { %2868 = vmatpush3.bf16.msra.mxu1 %v2185_v9 }
 0x8c9   : > { %2869 = vmatprep.subr.bf16.mxu1 %v3126_v44 }
 0x8cc   : > { %2870 = vmatpush3.bf16.msra.mxu1 %v2184_v59 }
 0x8cf   : > { %2872 = vmatmul.mubr.msk.bf16.vlgmr.msra.gmra.mxu1 %vm259_vm0, %v1022_v38 }
 0x921   : > { %v2847_v6 = vpop.f32.mrf.mxu1 }
 0x922   : > { %v2010_v46 = vadd.f32 %v2847_v6, %v3696_v32 }
 0x923   : > { %v1977_v47 = vpop.f32.mrf.mxu1 }
 0x924   : > { %v2008_v5 = vadd.f32 %v1977_v47, %v3700_v33 }
 0x925   : > { %v2848_v55 = vpop.f32.mrf.mxu1 }
 0x926   : > { %v2011_v44 = vadd.f32 %v2848_v55, %v3704_v53 }
 0x927   : > { %v1980_v3 = vpop.f32.mrf.mxu1 }
 0x928   : > { %v2009_v35 = vadd.f32 %v1980_v3, %v3708_v4  ;;  %v2964_v4 = vld [vmem:[%s3852_s5 + $0x68] sm:$0xff]  }
 0x929   : > { %v2851_v37 = vpop.f32.mrf.mxu1 }
 0x92a   : > { %v2014_v38 = vadd.f32 %v2851_v37, %v3712_v27  ;;  %v2965_v27 = vld [vmem:[%s3852_s5 + $0x70] sm:$0xff]  }
 0x92b   : > { %v1993_v0 = vpop.f32.mrf.mxu1 }
 0x92c   : > { %v2012_v13 = vadd.f32 %v1993_v0, %v3716_v21  ;;  %v2966_v21 = vld [vmem:[%s3852_s5 + $0x78] sm:$0xff]  }
 0x92d   : > { %v2852_v48 = vpop.f32.mrf.mxu1 }
 0x92e   : > { %v2015_v20 = vadd.f32 %v2852_v48, %v3720_v19 }
 0x92f   : > { %v1996_v32 = vpop.f32.mrf.mxu1 }
 0x930   : > { %v2013_v8 = vadd.f32 %v1996_v32, %v3722_v62 }
 0x98f   : > { %v2225_v10 = vpop.f32.mrf.mxu1 }
 0x991   : > { %v2873_v33 = vpop.f32.mrf.mxu1 }
 0x993   : > { %v2228_v29 = vpop.f32.mrf.mxu1 }
 0x994   : > { %v2241_v52 = vpack.c.bf16 %v2228_v29, %v2225_v10 }
 0x995   : > { %v2874_v53 = vpop.f32.mrf.mxu1 }
 0x996   : > { %2875 = vmatprep.subr.bf16.mxu0 %v2241_v52 }
 0x997   : > { %2876 = vmatpush3.bf16.msra.mxu0 %v2241_v52 }
 0x99a   : > { %2878 = vmatmul.mubr.msk.bf16.vlgmr.msra.gmra.mxu0 %vm1039_vm1, %v2964_v4 }
 0x99b   : > { %2881 = vmatprep.mubr.msk.bf16.mxu0 %vm1039_vm1, %v2965_v27 }
 0x9a2   : > { %2882 = vmatmul.mubr.msk.bf16.gmra.mxu0 %vm1039_vm1, %v2966_v21 }
 0xa5a   : > { %v2879_v19 = vpop.f32.mrf.mxu0 }
 0xa5b   : > { %v2341_v56 = vadd.f32 %v2879_v19, %v2010_v46 }
 0xa5c   : > { %v2308_v7 = vpop.f32.mrf.mxu0 }
 0xa5d   : > { %2349 = vst.msk [vmem:[%s244_s26 + $0x10] sm:$0xff] %vm259_vm0, %v2341_v56  ;;  %v2339_v57 = vadd.f32 %v2308_v7, %v2008_v5 }
 0xa5e   : > { %v2880_v23 = vpop.f32.mrf.mxu0 }
 0xa5f   : > { %2347 = vst.msk [vmem:[%s244_s26] sm:$0xff] %vm259_vm0, %v2339_v57  ;;  %v2342_v30 = vadd.f32 %v2880_v23, %v2011_v44 }
 0xa60   : > { %v2311_v61 = vpop.f32.mrf.mxu0 }
 0xa61   : > { %2350 = vst.msk [vmem:[%s244_s26 + $0x18] sm:$0xff] %vm259_vm0, %v2342_v30  ;;  %v2340_v11 = vadd.f32 %v2311_v61, %v2009_v35 }
 0xa62   : > { %v2883_v49 = vpop.f32.mrf.mxu0 }
 0xa63   : > { %2348 = vst.msk [vmem:[%s244_s26 + $0x8] sm:$0xff] %vm259_vm0, %v2340_v11  ;;  %v2345_v50 = vadd.f32 %v2883_v49, %v2014_v38 }
 0xa64   : > { %v2324_v1 = vpop.f32.mrf.mxu0 }
 0xa65   : > { %2353 = vst.msk [vmem:[%s244_s26 + $0x30] sm:$0xff] %vm259_vm0, %v2345_v50  ;;  %v2343_v63 = vadd.f32 %v2324_v1, %v2012_v13 }
 0xa66   : > { %v2884_v39 = vpop.f32.mrf.mxu0 }
 0xa67   : > { %2351 = vst.msk [vmem:[%s244_s26 + $0x20] sm:$0xff] %vm259_vm0, %v2343_v63  ;;  %v2346_v12 = vadd.f32 %v2884_v39, %v2015_v20 }
 0xa68   : > { %v2327_v14 = vpop.f32.mrf.mxu0 }
 0xa69   : > { %2354 = vst.msk [vmem:[%s244_s26 + $0x38] sm:$0xff] %vm259_vm0, %v2346_v12  ;;  %v2344_v28 = vadd.f32 %v2327_v14, %v2013_v8 }
 0xa6b   : > { %2352 = vst.msk [vmem:[%s244_s26 + $0x28] sm:$0xff] %vm259_vm0, %v2344_v28 }
 0xa6c   : > { %3076 = shalt.err (!%p3073_p3)
}
 0xa6d   : > { %s3077_s16 = scalar_lea.hbm %s3799_s10, 1024  ;;  %s3081_s19 = scalar_lea.hbm %s3853_s6, 2048 }
 0xa6e   : > { %p3078_p4 = scmp.ne.s32.totalorder %s3799_s10, %s3077_s16  ;;  %p3082_p9 = scmp.lt.s32.totalorder %s3799_s10, %s3853_s6 }
 0xa6f   : > { %p3083_p10 = scmp.lt.s32.totalorder %s3081_s19, %s3077_s16 }
 0xa70   : > { %p3079_p7 = pnand %p3078_p4, %p3204_p5 }
 0xa71   : > { %p3084_p11 = por %p3083_p10, %p3082_p9 }
 0xa72   : > { %p3080_p8 = pneg %p3079_p7 }
 0xa74   : > { %p3085_p12 = pnand %p3084_p11, %p3080_p8 }
 0xa76   : > { %3088 = shalt.err (!%p3085_p12)
}
 0xa77   : > { %s3129_s13 = smov 128   ;;  %s3130_s29 = smov 8  }
 0xa78   : > { %2893 = dma.vmem_to_hbm [thread:$0]  (%p3204_p5), %s3801_s28, 1024, %s3799_s10, %s3807_s25, %s3129_s13, %s3129_s13, %s3130_s29  }
 0xa79 PF: > { %p2899_p13 = scmp.ge.s32.totalorder %s3123_s24, 2  ;;  %s2384_s9 = sand.u32 1, %s3111_s21  }
 0xa7a   : > { %s2385_s11 = scalar_lea.sflag [#allocation3], %s2384_s9 }
 0xa7b   : > { %p2896_p0 = pnand %p2899_p13, %p3208_p6 }
 0xa7d   : > { %p2897_p1 = pneg %p2896_p0 }
 0xa7f   : > { %3106 = dma.done.wait (%p2897_p1), %s2385_s11, 1024  }
 0xa80   : > { %3108 = vsyncadd (%p2897_p1), %s2385_s11, 4294966272  ;;  %p16_p2 = scmp.ge.s32.totalorder %s3191_s27, 4   ;;  %s3856_s21 = smov %s3115_s22 }
 0xa81   : > { %s3857_s22 = smov %s3119_s23  ;;  %s3858_s23 = smov %s3202_s30 }
 0xa82   : > { %s3859_s24 = smov %s3191_s27  ;;  %18 = sbr.rel (!%p16_p2) target bundleno = 3 (0x3), region = 82 }
 0xa87   :  { %2390 = vsyncpa [#allocation3], 1 }
 0xa88   :  { %2392 = vsyncpa [#allocation3 + $0x1], 1 }

</bundles_post_ra>
